<compile_context>
chip_gen: v5e
topology: v5e:2x2
jax: 0.10.0
libtpu: 0.0.40
codegen_flags: <defaults>
</compile_context>

<pallas_src>
import jax
import jax.numpy as jnp
from jax import lax
from jax.experimental import pallas as pl
from jax.experimental.pallas import tpu as pltpu

# Module constants from the spec (gpt/v2.py).
N_EMBD = 384                    # fixed in the module
HEAD_SIZE = 64                  # = n_embd // n_head in gpt/v2
BLOCK_SIZE = 256                # max sequence length (tril buffer size)


def prepare_head_weights(wq, wk, wv):
    """One-time parameter prep (NOT per forward call).

    Folds the reference's C**-0.5 score scale into wq, zero-pads each head
    section to a 128-lane boundary, fuses Q|K|V into one (C, 3*W) block and
    casts to bf16 for the MXU.
    """
    C, HS = wq.shape
    W = ((HS + 127) // 128) * 128            # lane-aligned section width
    # NOTE: the reference scales by C**-0.5 with C = n_embd (NOT head_size);
    # this intentionally matches the PyTorch module.
    scale = float(C) ** -0.5

    def pad(w):
        return jnp.pad(w, ((0, 0), (0, W - HS)))

    wqkv = jnp.concatenate([pad(wq * scale), pad(wk), pad(wv)], axis=1)
    return wqkv.astype(jnp.bfloat16)          # (C, 3*W)


def head_kernel(x_ref, wqkv_ref, o_ref, qkv_scr):
    """Grid = (batch, q_tile).  x (1,T,C) f32, wqkv (C,3W) bf16 -> out (1,TQ,HS) f32."""
    qi = pl.program_id(1)
    TQ = o_ref.shape[1]
    HS = o_ref.shape[2]
    T, threeW = qkv_scr.shape
    W = threeW // 3

    # Fused Q|K|V projection: one MXU pass per batch element, persisted in
    # VMEM scratch (bf16) across all q-tiles of this batch element.
    @pl.when(qi == 0)
    def _():
        x_bf = x_ref[0].astype(jnp.bfloat16)                     # (T, C)
        qkv = jnp.dot(x_bf, wqkv_ref[...],
                      preferred_element_type=jnp.float32)        # (T, 3W) f32
        qkv_scr[...] = qkv.astype(jnp.bfloat16)                  # single cast pass

    row0 = pl.multiple_of(qi * TQ, TQ)
    q = qkv_scr[pl.ds(row0, TQ), :W]          # (TQ, W) bf16, scale already folded in
    k = qkv_scr[:, W:2 * W]                   # (T,  W) bf16
    v = qkv_scr[:, 2 * W:3 * W]               # (T,  W) bf16

    # Scores: contract last axes directly (no explicit k.T relayout).
    s = lax.dot_general(q, k,
                        dimension_numbers=(((1,), (1,)), ((), ())),
                        preferred_element_type=jnp.float32)      # (TQ, T) f32

    # Causal mask: one (TQ, T) column iota vs. a (TQ, 1) global-row vector.
    col = lax.broadcasted_iota(jnp.int32, (TQ, T), 1)
    row = row0 + lax.broadcasted_iota(jnp.int32, (TQ, 1), 0)
    s = jnp.where(col <= row, s, -jnp.inf)

    # Softmax in f32 (v5e-safe); normalization via approx reciprocal (EUP).
    s = s - jnp.max(s, axis=-1, keepdims=True)
    p = jnp.exp(s)
    p = p * pl.reciprocal(jnp.sum(p, axis=-1, keepdims=True), approx=True)
    # (attention dropout = identity in eval mode)

    out = jnp.dot(p.astype(jnp.bfloat16), v,
                  preferred_element_type=jnp.float32)            # (TQ, W) f32
    o_ref[0] = out[:, :HS].astype(o_ref.dtype)                   # unpadded store


def head_forward(x, wqkv_bf, head_size):
    """x: (B,T,C) f32; wqkv_bf: prepared (C, 3*W) bf16.  Returns (B,T,head_size) f32."""
    B, T, C = x.shape
    threeW = wqkv_bf.shape[1]

    TQ = min(128, T)                 # query-tile rows per grid step
    assert T % TQ == 0, "T must be a multiple of the query tile"
    nq = T // TQ

    return pl.pallas_call(
        head_kernel,
        out_shape=jax.ShapeDtypeStruct((B, T, head_size), jnp.float32),
        grid_spec=pltpu.PrefetchScalarGridSpec(
            num_scalar_prefetch=0,
            grid=(B, nq),
            in_specs=[
                # x: constant block index across q-tiles -> DMA'd once per batch.
                pl.BlockSpec((1, T, C), lambda b, qi: (b, 0, 0)),
                # fused weights: resident for the whole grid.
                pl.BlockSpec((C, threeW), lambda b, qi: (0, 0)),
            ],
            out_specs=pl.BlockSpec((1, TQ, head_size), lambda b, qi: (b, qi, 0)),
            scratch_shapes=[
                # Persisted QKV projection for the current batch element.
                pltpu.VMEM((T, threeW), jnp.bfloat16),
            ],
        ),
        compiler_params=pltpu.CompilerParams(
            # Batch steps are independent -> shard across TensorCores on v7x.
            # q-tile axis is "arbitrary": the QKV scratch persists across it.
            dimension_semantics=("parallel", "arbitrary"),
        ),
    )(x, wqkv_bf)


def head_reference(x, wq, wk, wv):
    """Pure-JAX f32 reference reproducing the PyTorch forward (eval mode)."""
    B, T, C = x.shape
    q = x @ wq
    k = x @ wk
    v = x @ wv
    wei = jnp.einsum("btd,bsd->bts", q, k) * (C ** -0.5)
    mask = jnp.tril(jnp.ones((T, T), dtype=bool))
    wei = jnp.where(mask, wei, -jnp.inf)
    wei = jax.nn.softmax(wei, axis=-1)
    return jnp.einsum("bts,bsd->btd", wei, v)


if __name__ == "__main__":
    B, T = 2, 128                      # T <= block_size (256)
    assert T <= BLOCK_SIZE

    key = jax.random.PRNGKey(0)
    kx, kq, kk, kv = jax.random.split(key, 4)

    x = jax.random.normal(kx, (B, T, N_EMBD), jnp.float32)

    # PyTorch nn.Linear(n_embd, head_size, bias=False) init:
    # uniform(-1/sqrt(n_embd), 1/sqrt(n_embd)), stored here as (in, out).
    bound = 1.0 / (N_EMBD ** 0.5)
    wq = jax.random.uniform(kq, (N_EMBD, HEAD_SIZE), jnp.float32, -bound, bound)
    wk = jax.random.uniform(kk, (N_EMBD, HEAD_SIZE), jnp.float32, -bound, bound)
    wv = jax.random.uniform(kv, (N_EMBD, HEAD_SIZE), jnp.float32, -bound, bound)

    # One-time parameter preparation (not part of the per-call forward).
    wqkv_bf = jax.block_until_ready(prepare_head_weights(wq, wk, wv))

    out = jax.block_until_ready(head_forward(x, wqkv_bf, HEAD_SIZE))
    ref = head_reference(x, wq, wk, wv)

    assert out.shape == (B, T, HEAD_SIZE)
    # Tolerance sized for bf16 MXU operands / bf16 QKV scratch + approx
    # reciprocal vs the f32 reference.
    assert jnp.allclose(out, ref, atol=3e-2, rtol=5e-2), "mismatch vs reference"

    print("KERNEL_OK")
</pallas_src>

<mosaic_0001>
module attributes {stable_mosaic.version = 11 : i64} {
  func.func @head_kernel(%arg0: i32, %arg1: i32, %arg2: memref<1x128x384xf32, #tpu.memory_space<vmem>>, %arg3: memref<384x384xbf16, #tpu.memory_space<vmem>>, %arg4: memref<1x128x64xf32, #tpu.memory_space<vmem>>, %arg5: memref<128x384xbf16, #tpu.memory_space<vmem>>) attributes {dimension_semantics = [#tpu.dimension_semantics<parallel>, #tpu.dimension_semantics<arbitrary>], iteration_bounds = array<i64: 2, 1>, scalar_prefetch = 0 : i64, scratch_operands = 1 : i64, tpu.core_type = #tpu.core_type<tc>, window_params = [{transform_indices = @transform_0, window_bounds = array<i64: 1, 128, 384>}, {pipeline_mode = #tpu.pipeline_mode<synchronous>, transform_indices = @transform_1, window_bounds = array<i64: 384, 384>}, {transform_indices = @transform_2, window_bounds = array<i64: 1, 128, 64>}]} {
    %c0_i32 = arith.constant 0 : i32
    %0 = arith.cmpi eq, %arg1, %c0_i32 : i32
    %1 = arith.extui %0 : i1 to i32
    %c0_i32_0 = arith.constant 0 : i32
    %2 = arith.cmpi ne, %1, %c0_i32_0 : i32
    scf.if %2 {
      %c0_10 = arith.constant 0 : index
      %c0_11 = arith.constant 0 : index
      %c0_12 = arith.constant 0 : index
      %34 = vector.load %arg2[%c0_10, %c0_11, %c0_12] : memref<1x128x384xf32, #tpu.memory_space<vmem>>, vector<1x128x384xf32>
      %35 = vector.shape_cast %34 : vector<1x128x384xf32> to vector<128x384xf32>
      %36 = arith.truncf %35 : vector<128x384xf32> to vector<128x384xbf16>
      %c0_13 = arith.constant 0 : index
      %c0_14 = arith.constant 0 : index
      %37 = vector.load %arg3[%c0_13, %c0_14] : memref<384x384xbf16, #tpu.memory_space<vmem>>, vector<384x384xbf16>
      %cst_15 = arith.constant dense<0.000000e+00> : vector<128x384xf32>
      %38 = tpu.matmul %36, %37, %cst_15 {dimension_numbers = #tpu.dot_dimension_numbers<[1], [0], [0], [1], [0, 0, 1, 1], [], []>} : vector<128x384xbf16>, vector<384x384xbf16>, vector<128x384xf32> -> vector<128x384xf32>
      %39 = arith.truncf %38 : vector<128x384xf32> to vector<128x384xbf16>
      %c0_16 = arith.constant 0 : index
      %c0_17 = arith.constant 0 : index
      %40 = vector.load %arg5[%c0_16, %c0_17] : memref<128x384xbf16, #tpu.memory_space<vmem>>, vector<128x384xbf16>
      tpu.vector_store %arg5[%c0_16, %c0_17], %39 {strides = array<i32>} : memref<128x384xbf16, #tpu.memory_space<vmem>>, vector<128x384xbf16>,
    } else {
    }
    %c128_i32 = arith.constant 128 : i32
    %3 = arith.muli %arg1, %c128_i32 : i32
    %4 = tpu.assume_multiple %3, 128 : i32
    %5 = arith.index_cast %4 : i32 to index
    %c0 = arith.constant 0 : index
    %6 = vector.load %arg5[%5, %c0] : memref<128x384xbf16, #tpu.memory_space<vmem>>, vector<128x128xbf16>
    %c0_1 = arith.constant 0 : index
    %c128 = arith.constant 128 : index
    %7 = vector.load %arg5[%c0_1, %c128] : memref<128x384xbf16, #tpu.memory_space<vmem>>, vector<128x128xbf16>
    %c0_2 = arith.constant 0 : index
    %c256 = arith.constant 256 : index
    %8 = vector.load %arg5[%c0_2, %c256] : memref<128x384xbf16, #tpu.memory_space<vmem>>, vector<128x128xbf16>
    %cst = arith.constant dense<0.000000e+00> : vector<128x128xf32>
    %9 = tpu.matmul %6, %7, %cst {dimension_numbers = #tpu.dot_dimension_numbers<[1], [1], [0], [0], [0, 0, 1, 0], [], []>} : vector<128x128xbf16>, vector<128x128xbf16>, vector<128x128xf32> -> vector<128x128xf32>
    %10 = tpu.iota {dimensions = array<i32: 1>} : vector<128x128xi32>
    %11 = tpu.iota {dimensions = array<i32: 0>} : vector<128x1xi32>
    %12 = vector.broadcast %4 : i32 to vector<128x1xi32>
    %13 = arith.addi %12, %11 : vector<128x1xi32>
    %14 = vector.broadcast %13 : vector<128x1xi32> to vector<128x128xi32>
    %15 = arith.cmpi sle, %10, %14 : vector<128x128xi32>
    %cst_3 = arith.constant 0xFF800000 : f32
    %16 = vector.broadcast %cst_3 : f32 to vector<128x128xf32>
    %17 = arith.select %15, %9, %16 : vector<128x128xi1>, vector<128x128xf32>
    %cst_4 = arith.constant dense<0xFF800000> : vector<128xf32>
    %18 = vector.multi_reduction <maximumf>, %17, %cst_4 [1] : vector<128x128xf32> to vector<128xf32>
    %19 = vector.shape_cast %18 : vector<128xf32> to vector<128x1xf32>
    %20 = vector.broadcast %19 : vector<128x1xf32> to vector<128x128xf32>
    %21 = arith.subf %17, %20 : vector<128x128xf32>
    %22 = math.exp %21 : vector<128x128xf32>
    %cst_5 = arith.constant dense<0.000000e+00> : vector<128xf32>
    %23 = vector.multi_reduction <add>, %22, %cst_5 [1] : vector<128x128xf32> to vector<128xf32>
    %24 = vector.shape_cast %23 : vector<128xf32> to vector<128x1xf32>
    %25 = tpu.reciprocal %24 {approx = true} : vector<128x1xf32> -> vector<128x1xf32>
    %26 = vector.broadcast %25 : vector<128x1xf32> to vector<128x128xf32>
    %27 = arith.mulf %22, %26 : vector<128x128xf32>
    %28 = arith.truncf %27 : vector<128x128xf32> to vector<128x128xbf16>
    %cst_6 = arith.constant dense<0.000000e+00> : vector<128x128xf32>
    %29 = tpu.matmul %28, %8, %cst_6 {dimension_numbers = #tpu.dot_dimension_numbers<[1], [0], [0], [1], [0, 0, 1, 1], [], []>} : vector<128x128xbf16>, vector<128x128xbf16>, vector<128x128xf32> -> vector<128x128xf32>
    %30 = vector.extract_strided_slice %29 {offsets = [0, 0], sizes = [128, 64], strides = [1, 1]} : vector<128x128xf32> to vector<128x64xf32>
    %c0_7 = arith.constant 0 : index
    %c0_8 = arith.constant 0 : index
    %c0_9 = arith.constant 0 : index
    %31 = vector.load %arg4[%c0_7, %c0_8, %c0_9] : memref<1x128x64xf32, #tpu.memory_space<vmem>>, vector<1x128x64xf32>
    %32 = vector.shape_cast %31 : vector<1x128x64xf32> to vector<128x64xf32>
    %33 = vector.shape_cast %30 : vector<128x64xf32> to vector<1x128x64xf32>
    tpu.vector_store %arg4[%c0_7, %c0_8, %c0_9], %33 {strides = array<i32>} : memref<1x128x64xf32, #tpu.memory_space<vmem>>, vector<1x128x64xf32>,
    return
  }
  func.func @transform_0(%arg0: i32, %arg1: i32) -> (i32, i32, i32) {
    %c0_i32 = arith.constant 0 : i32
    %c0_i32_0 = arith.constant 0 : i32
    %c0_i32_1 = arith.constant 0 : i32
    return %arg0, %c0_i32, %c0_i32_0 : i32, i32, i32
  }
  func.func @transform_1(%arg0: i32, %arg1: i32) -> (i32, i32) {
    %c0_i32 = arith.constant 0 : i32
    %c0_i32_0 = arith.constant 0 : i32
    %c0_i32_1 = arith.constant 0 : i32
    return %c0_i32, %c0_i32_0 : i32, i32
  }
  func.func @transform_2(%arg0: i32, %arg1: i32) -> (i32, i32, i32) {
    %c0_i32 = arith.constant 0 : i32
    %c0_i32_0 = arith.constant 0 : i32
    return %arg0, %arg1, %c0_i32 : i32, i32, i32
  }
}

</mosaic_0001>

<bundles_post_ra>
// kernel: tpu_custom_call.1
= control target key start
LH: loop header
LB: loop body
LE: loop exit
PB: predicated region body
PF: predicated region fallthrough
CT: control target
= control target key end

     0   :  { %7 = vsyncpa [#allocation4], 0  ;;  %s3269_s0 = inlined_call_operand.hbm [shape: f32[2,128,384], index: 0, kind: input, shape index: {}]   ;;  %s3270_s1 = inlined_call_operand.hbm [shape: bf16[384,384], index: 1, kind: input, shape index: {}]   ;;  %s3271_s2 = inlined_call_operand.vmem [shape: f32[2,128,64], index: 2, kind: output, shape index: {}]  }
   0x1   :  { %9 = vsyncpa [#allocation4 + $0x1], 0 }
   0x2   :  { %10 = vsyncpa [#allocation6], 0  ;;  %s2694_s9 = smov 0   ;;  %s2696_s10 = smov 0  }
   0x3   :  { %s2698_s11 = smov 0   ;;  %s2700_s12 = smov 0  }
   0x4   :  { %s2702_s13 = smov 0   ;;  %s2704_s14 = smov 0  }
   0x5 LB: > { %s1904_s15 = sadd.s32 4294967295, %s2672_s14   ;;  %p48_p0 = scmp.ne.s32.totalorder %s2656_s10, %s2652_s9  ;;  %s2672_s14 = sphi %s2704_s14, %s16_s14   ;;  %s2668_s13 = sphi %s2702_s13, %s3297_s13   ;;  %s2664_s12 = sphi %s2700_s12, %s3296_s12   ;;  %s2660_s11 = sphi %s2698_s11, %s3295_s11   ;;  %s2656_s10 = sphi %s2696_s10, %s3294_s10   ;;  %s2652_s9 = sphi %s2694_s9, %s3293_s9  }
   0x6   : > { %p2724_p1 = scmp.eq.s32.totalorder %s1904_s15, 0  ;;  %p1906_p2 = scmp.ge.s32.totalorder %s2672_s14, 1 }
   0x7   : > { %p108_p3 = scmp.lt.s32.totalorder %s2672_s14, 3  ;;  %s119_s20 = sshll.u32 %s3270_s1, 4  ;;  %s120_s20 = int_to_ptr.hbm [resolvable:$true] %s119_s20 }
   0x8   : > { %p2732_p4 = por %p2724_p1, %p48_p0  ;;  %s2674_s22 = smov [#allocation5]  }
   0x9   : > { %p2739_p5 = pnand %p1906_p2, %p108_p3  ;;  %s121_s23 = sshll.u32 %s2674_s22, 4  ;;  %s122_s23 = int_to_ptr.vmem [resolvable:$true] %s121_s23 }
   0xa   : > { %s2675_s24 = smov 192   ;;  %s2676_s25 = smov 12  }
   0xb   : > { %p2430_p6 = pneg %p2739_p5  ;;  %s28_s26 = sadd.s32 1, %s2668_s13 }
   0xc   : > { %p30_p8 = scmp.ge.s32.totalorder %s28_s26, 2  ;;  %s35_s27 = sadd.s32 1, %s2660_s11 }
   0xd   : > { %p2431_p7 = pnand %p2430_p6, %p2724_p1  ;;  %p42_p9 = scmp.ne.s32.totalorder %s2660_s11, %s2656_s10 }
   0xe   : > { %p43_p10 = scmp.eq.s32.totalorder %s2672_s14, 0  ;;  %s3299_s26 = smov (%p30_p8, %s28_s26), 0 }
   0xf   : > { %2433 = dma.hbm_to_vmem [thread:$0]  (!%p2431_p7), %s120_s20, 9216, %s122_s23, [#allocation6], %s2675_s24, %s2675_s24, %s2676_s25  }
  0x10   : > { %p44_p11 = por %p43_p10, %p42_p9  ;;  %p2439_p12 = scmp.lt.s32.totalorder %s2672_s14, 2 }
  0x11   : > { %s32_s28 = ssub.s32 %s2668_s13, %s3299_s26  ;;  %s135_s29 = sand.u32 1, %s2660_s11  }
  0x12   : > { %p33_p13 = scmp.eq.s32.totalorder %s32_s28, 0  ;;  %s2421_s30 = smul.u32 384, %s135_s29 }
  0x13   : > { %p2435_p0 = pnand %p2439_p12, %p44_p11  ;;  %s2422_s4 = smul.u32 384, %s2668_s13 }
  0x14   : > { %s2759_s3 = scalar_select %p33_p13, %s2660_s11, %s35_s27  }
  0x15   : > { %s139_s5 = scalar_lea.vmem [#allocation3], %s2421_s30  ;;  %s144_s9 = scalar_lea.hbm %s3269_s0, %s2422_s4 }
  0x16   : > { %s147_s6 = sshll.u32 %s139_s5, 4  ;;  %s145_s15 = sshll.u32 %s144_s9, 4  ;;  %s148_s6 = int_to_ptr.vmem [resolvable:$true] %s147_s6  ;;  %s146_s15 = int_to_ptr.hbm [resolvable:$true] %s145_s15 }
  0x17   : > { %s136_s18 = scalar_lea.sflag [#allocation4], %s135_s29  ;;  %s2677_s19 = smov 384  }
  0x18   : > { %s2678_s20 = smov 24   ;;  %159 = sbr.rel (%p2739_p5) target bundleno = 1202 (0x4b2), region = 28 }
  0x19   : > { %2437 = dma.hbm_to_vmem [thread:$0]  (!%p2435_p0), %s146_s15, 6144, %s148_s6, %s136_s18, %s2677_s19, %s2677_s19, %s2678_s20  }
  0x1d   : > { %s161_s22 = sand.u32 1, %s2656_s10  }
  0x1e   : > { %s2423_s23 = smul.u32 384, %s161_s22  ;;  %s162_s24 = scalar_lea.sflag [#allocation4], %s161_s22 }
  0x20   : > { %s2768_s25 = scalar_lea.vmem [#allocation3], %s2423_s23 }
  0x21   : > { %2643 = dma.done.wait (%p2732_p4), %s162_s24, 6144  }
  0x22   : > { %2645 = vsyncadd (%p2732_p4), %s162_s24, 4294961152 }
  0x23   : > { %2647 = dma.done.wait (%p2724_p1), [#allocation6], 9216  }
  0x24   : > { %2649 = vsyncadd (%p2724_p1), [#allocation6], 4294958080  ;;  %v2000_v0 = vld [vmem:[#allocation5 + $0xa8] sm:$0xf]  ;;  %v2323_v1 = vld [vmem:[#allocation5 + $0xb0] sm:$0xf0] }
  0x25   : > { %v2096_v2 = vld [vmem:[#allocation5 + $0x168] sm:$0xf]  ;;  %v2001_v3 = vor.u32 %v2323_v1, %v2000_v0  ;;  %v2347_v4 = vld [vmem:[#allocation5 + $0x170] sm:$0xf0]  ;;  %v1988_v9 = vld [vmem:[#allocation5 + $0x90] sm:$0xf] }
  0x26   : > { %v2192_v5 = vld [vmem:[#allocation5 + $0x228] sm:$0xf]  ;;  %v2371_v6 = vld [vmem:[#allocation5 + $0x230] sm:$0xf0]  ;;  %v2778_v7 = vor.u32 %v2347_v4, %v2096_v2  ;;  %v2320_v10 = vld [vmem:[#allocation5 + $0x98] sm:$0xf0] }
  0x27   : > { %v2780_v8 = vor.u32 %v2371_v6, %v2192_v5  ;;  %v2084_v11 = vld [vmem:[#allocation5 + $0x150] sm:$0xf]  ;;  %762 = vmatpush.bf16.msra.mxu0 %v2001_v3  ;;  %2397 = vmatpush.bf16.msra.mxu3 %v2001_v3  ;;  %v1989_v12 = vor.u32 %v2320_v10, %v1988_v9  ;;  %v2344_v13 = vld [vmem:[#allocation5 + $0x158] sm:$0xf0]  ;;  %v1976_v18 = vld [vmem:[#allocation5 + $0x78] sm:$0xf] }
  0x28   : > { %v2180_v14 = vld [vmem:[#allocation5 + $0x210] sm:$0xf]  ;;  %v2368_v15 = vld [vmem:[#allocation5 + $0x218] sm:$0xf0]  ;;  %2405 = vmatpush.bf16.msra.mxu1 %v2778_v7  ;;  %v2784_v16 = vor.u32 %v2344_v13, %v2084_v11  ;;  %v2317_v19 = vld [vmem:[#allocation5 + $0x80] sm:$0xf0] }
  0x29   : > { %2413 = vmatpush.bf16.msra.mxu2 %v2780_v8  ;;  %v2786_v17 = vor.u32 %v2368_v15, %v2180_v14  ;;  %v2072_v20 = vld [vmem:[#allocation5 + $0x138] sm:$0xf]  ;;  %v2341_v21 = vld [vmem:[#allocation5 + $0x140] sm:$0xf0]  ;;  %v1977_v24 = vor.u32 %v2317_v19, %v1976_v18  ;;  %v1964_v27 = vld [vmem:[#allocation5 + $0x60] sm:$0xf] }
  0x2a   : > { %v2168_v22 = vld [vmem:[#allocation5 + $0x1f8] sm:$0xf]  ;;  %v2365_v23 = vld [vmem:[#allocation5 + $0x200] sm:$0xf0]  ;;  %v2790_v25 = vor.u32 %v2341_v21, %v2072_v20  ;;  %v2314_v28 = vld [vmem:[#allocation5 + $0x68] sm:$0xf0] }
  0x2b   : > { %763 = vmatpush.bf16.msra.mxu0 %v1989_v12  ;;  %2398 = vmatpush.bf16.msra.mxu3 %v1989_v12  ;;  %v2792_v26 = vor.u32 %v2365_v23, %v2168_v22  ;;  %v2060_v29 = vld [vmem:[#allocation5 + $0x120] sm:$0xf]  ;;  %v2338_v30 = vld [vmem:[#allocation5 + $0x128] sm:$0xf0]  ;;  %v1965_v33 = vor.u32 %v2314_v28, %v1964_v27  ;;  %v1952_v36 = vld [vmem:[#allocation5 + $0x48] sm:$0xf] }
  0x2c   : > { %2406 = vmatpush.bf16.msra.mxu1 %v2784_v16  ;;  %v2156_v31 = vld [vmem:[#allocation5 + $0x1e0] sm:$0xf]  ;;  %v2362_v32 = vld [vmem:[#allocation5 + $0x1e8] sm:$0xf0]  ;;  %v2796_v34 = vor.u32 %v2338_v30, %v2060_v29  ;;  %v2311_v37 = vld [vmem:[#allocation5 + $0x50] sm:$0xf0] }
  0x2d   : > { %2414 = vmatpush.bf16.msra.mxu2 %v2786_v17  ;;  %v2798_v35 = vor.u32 %v2362_v32, %v2156_v31  ;;  %v2048_v38 = vld [vmem:[#allocation5 + $0x108] sm:$0xf]  ;;  %v2335_v39 = vld [vmem:[#allocation5 + $0x110] sm:$0xf0]  ;;  %v1953_v42 = vor.u32 %v2311_v37, %v1952_v36  ;;  %v1940_v45 = vld [vmem:[#allocation5 + $0x30] sm:$0xf] }
  0x2e   : > { %v2144_v40 = vld [vmem:[#allocation5 + $0x1c8] sm:$0xf]  ;;  %v2359_v41 = vld [vmem:[#allocation5 + $0x1d0] sm:$0xf0]  ;;  %v2802_v43 = vor.u32 %v2335_v39, %v2048_v38  ;;  %v2308_v46 = vld [vmem:[#allocation5 + $0x38] sm:$0xf0] }
  0x2f   : > { %764 = vmatpush.bf16.msra.mxu0 %v1977_v24  ;;  %2399 = vmatpush.bf16.msra.mxu3 %v1977_v24  ;;  %v2804_v44 = vor.u32 %v2359_v41, %v2144_v40  ;;  %v2036_v47 = vld [vmem:[#allocation5 + $0xf0] sm:$0xf]  ;;  %v2332_v48 = vld [vmem:[#allocation5 + $0xf8] sm:$0xf0]  ;;  %v1941_v51 = vor.u32 %v2308_v46, %v1940_v45  ;;  %v1928_v54 = vld [vmem:[#allocation5 + $0x18] sm:$0xf] }
  0x30   : > { %2407 = vmatpush.bf16.msra.mxu1 %v2790_v25  ;;  %v2132_v49 = vld [vmem:[#allocation5 + $0x1b0] sm:$0xf]  ;;  %v2356_v50 = vld [vmem:[#allocation5 + $0x1b8] sm:$0xf0]  ;;  %v2808_v52 = vor.u32 %v2332_v48, %v2036_v47  ;;  %v2305_v55 = vld [vmem:[#allocation5 + $0x20] sm:$0xf0] }
  0x31   : > { %2415 = vmatpush.bf16.msra.mxu2 %v2792_v26  ;;  %v2810_v53 = vor.u32 %v2356_v50, %v2132_v49  ;;  %v2024_v56 = vld [vmem:[#allocation5 + $0xd8] sm:$0xf]  ;;  %v2329_v57 = vld [vmem:[#allocation5 + $0xe0] sm:$0xf0]  ;;  %v1929_v60 = vor.u32 %v2305_v55, %v1928_v54  ;;  %v1916_v63 = vld [vmem:[#allocation5] sm:$0xf] }
  0x32   : > { %v2120_v58 = vld [vmem:[#allocation5 + $0x198] sm:$0xf]  ;;  %v2353_v59 = vld [vmem:[#allocation5 + $0x1a0] sm:$0xf0]  ;;  %v2025_v61 = vor.u32 %v2329_v57, %v2024_v56  ;;  %v2302_v0 = vld [vmem:[#allocation5 + $0x8] sm:$0xf0] }
  0x33   : > { %765 = vmatpush.bf16.msra.mxu0 %v1965_v33  ;;  %2400 = vmatpush.bf16.msra.mxu3 %v1965_v33  ;;  %v2814_v62 = vor.u32 %v2353_v59, %v2120_v58  ;;  %v2012_v1 = vld [vmem:[#allocation5 + $0xc0] sm:$0xf]  ;;  %v2326_v2 = vld [vmem:[#allocation5 + $0xc8] sm:$0xf0]  ;;  %v213_v6 = vld [vmem:[%s2768_s25 + $0x18] sm:$0xff]  ;;  %v1917_v9 = vor.u32 %v2302_v0, %v1916_v63  ;;  %p197_p1 = scmp.lt.s32.totalorder %s2664_s12, 1 }
  0x34   : > { %2408 = vmatpush.bf16.msra.mxu1 %v2796_v34  ;;  %v2108_v3 = vld [vmem:[#allocation5 + $0x180] sm:$0xf]  ;;  %v2350_v4 = vld [vmem:[#allocation5 + $0x188] sm:$0xf0]  ;;  %v225_v11 = vld [vmem:[%s2768_s25 + $0x78] sm:$0xff]  ;;  %v2013_v13 = vor.u32 %v2326_v2, %v2012_v1 }
  0x35   : > { %2416 = vmatpush.bf16.msra.mxu2 %v2798_v35  ;;  %v210_v5 = vld [vmem:[%s2768_s25] sm:$0xff]  ;;  %v223_v12 = vld [vmem:[%s2768_s25 + $0x68] sm:$0xff]  ;;  %v2822_v14 = vor.u32 %v2350_v4, %v2108_v3  ;;  %v224_v18 = vld [vmem:[%s2768_s25 + $0x70] sm:$0xff]  ;;  %s3301_s12 = smov (!%p197_p1, %s2664_s12), 1 }
  0x36   : > { %v222_v10 = vld [vmem:[%s2768_s25 + $0x60] sm:$0xff]  ;;  %v227_v19 = vld [vmem:[%s2768_s25 + $0x88] sm:$0xff]  ;;  %v2827_v20 = vpack.c.bf16 %v213_v6, %v210_v5  ;;  %v216_v24 = vld [vmem:[%s2768_s25 + $0x30] sm:$0xff]  ;;  %s2300_s16 = sshll.u32 %s3301_s12, 7 }
  0x37   : > { %766 = vmatpush.bf16.msra.mxu0 %v1953_v42  ;;  %2401 = vmatpush.bf16.msra.mxu3 %v1953_v42  ;;  %v226_v15 = vld [vmem:[%s2768_s25 + $0x80] sm:$0xff]  ;;  %v2829_v21 = vpack.c.bf16 %v225_v11, %v222_v10  ;;  %v2833_v23 = vpack.c.bf16 %v227_v19, %v224_v18  ;;  %v219_v27 = vld [vmem:[%s2768_s25 + $0x48] sm:$0xff]  ;;  %v228_v28 = vld [vmem:[%s2768_s25 + $0x90] sm:$0xff]  ;;  %s3213_s27 = scalar_lea.vmem %s3271_s2, %s2300_s16 }
  0x38   : > { %2409 = vmatpush.bf16.msra.mxu1 %v2802_v43  ;;  %v2831_v22 = vpack.c.bf16 %v226_v15, %v223_v12  ;;  %v231_v29 = vld [vmem:[%s2768_s25 + $0xa8] sm:$0xff]  ;;  %v229_v30 = vld [vmem:[%s2768_s25 + $0x98] sm:$0xff]  ;;  %v232_v31 = vld [vmem:[%s2768_s25 + $0xb0] sm:$0xff]  ;;  %v2852_v33 = vpack.c.bf16 %v219_v27, %v216_v24 }
  0x39   : > { %2417 = vmatpush.bf16.msra.mxu2 %v2804_v44  ;;  %v233_v32 = vld [vmem:[%s2768_s25 + $0xb8] sm:$0xff]  ;;  %v211_v38 = vld [vmem:[%s2768_s25 + $0x8] sm:$0xff]  ;;  %v214_v39 = vld [vmem:[%s2768_s25 + $0x20] sm:$0xff] }
  0x3a   : > { %v237_v37 = vld [vmem:[%s2768_s25 + $0xd8] sm:$0xff]  ;;  %v235_v40 = vld [vmem:[%s2768_s25 + $0xc8] sm:$0xff]  ;;  %v238_v41 = vld [vmem:[%s2768_s25 + $0xe0] sm:$0xff]  ;;  %v2876_v46 = vpack.c.bf16 %v214_v39, %v211_v38 }
  0x3b   : > { %767 = vmatpush.bf16.msra.mxu0 %v1941_v51  ;;  %2402 = vmatpush.bf16.msra.mxu3 %v1941_v51  ;;  %v236_v42 = vld [vmem:[%s2768_s25 + $0xd0] sm:$0xff]  ;;  %v239_v45 = vld [vmem:[%s2768_s25 + $0xe8] sm:$0xff]  ;;  %v2879_v47 = vpack.c.bf16 %v238_v41, %v235_v40  ;;  %v2002_v50 = vld [vmem:[#allocation5 + $0xb4] sm:$0xf0] }
  0x3c   : > { %2410 = vmatpush.bf16.msra.mxu1 %v2808_v52  ;;  %v2881_v48 = vpack.c.bf16 %v239_v45, %v236_v42  ;;  %v2322_v49 = vld [vmem:[#allocation5 + $0xac] sm:$0xf]  ;;  %v2194_v54 = vld [vmem:[#allocation5 + $0x234] sm:$0xf0]  ;;  %v2319_v55 = vld [vmem:[#allocation5 + $0x94] sm:$0xf] }
  0x3d   : > { %2418 = vmatpush.bf16.msra.mxu2 %v2810_v53  ;;  %v2005_v51 = vor.u32 %v2322_v49, %v2002_v50  ;;  %v1990_v56 = vld [vmem:[#allocation5 + $0x9c] sm:$0xf0]  ;;  %v2367_v58 = vld [vmem:[#allocation5 + $0x214] sm:$0xf]  ;;  %v1978_v63 = vld [vmem:[#allocation5 + $0x84] sm:$0xf0] }
  0x3e   : > { %v1993_v57 = vor.u32 %v2319_v55, %v1990_v56  ;;  %v2182_v59 = vld [vmem:[#allocation5 + $0x21c] sm:$0xf0]  ;;  %v2364_v0 = vld [vmem:[#allocation5 + $0x1fc] sm:$0xf]  ;;  %v2313_v2 = vld [vmem:[#allocation5 + $0x64] sm:$0xf] }
  0x3f   : > { %768 = vmatpush.bf16.msra.mxu0 %v1929_v60  ;;  %2403 = vmatpush.bf16.msra.mxu3 %v1929_v60  ;;  %v2185_v60 = vor.u32 %v2367_v58, %v2182_v59  ;;  %v1966_v3 = vld [vmem:[#allocation5 + $0x6c] sm:$0xf0]  ;;  %v243_v5 = vld [vmem:[%s2768_s25 + $0x108] sm:$0xff]  ;;  %v241_v11 = vld [vmem:[%s2768_s25 + $0xf8] sm:$0xff] }
  0x40   : > { %2411 = vmatpush.bf16.msra.mxu1 %v2025_v61  ;;  %v240_v4 = vld [vmem:[%s2768_s25 + $0xf0] sm:$0xff]  ;;  %v245_v15 = vld [vmem:[%s2768_s25 + $0x118] sm:$0xff]  ;;  %v1969_v18 = vor.u32 %v2313_v2, %v1966_v3  ;;  %v2361_v19 = vld [vmem:[#allocation5 + $0x1e4] sm:$0xf] }
  0x41   : > { %2419 = vmatpush.bf16.msra.mxu2 %v2814_v62  ;;  %v220_v10 = vld [vmem:[%s2768_s25 + $0x50] sm:$0xff]  ;;  %v2898_v24 = vpack.c.bf16 %v243_v5, %v240_v4  ;;  %v1942_v38 = vld [vmem:[#allocation5 + $0x3c] sm:$0xf0]  ;;  %v2346_v39 = vld [vmem:[#allocation5 + $0x16c] sm:$0xf] }
  0x42   : > { %v244_v12 = vld [vmem:[%s2768_s25 + $0x110] sm:$0xff]  ;;  %v2134_v42 = vld [vmem:[#allocation5 + $0x1bc] sm:$0xf0]  ;;  %v2098_v45 = vld [vmem:[#allocation5 + $0x174] sm:$0xf0] }
  0x43   : > { %769 = vmatpush.bf16.msra.mxu0 %v1917_v9  ;;  %2404 = vmatpush.bf16.msra.mxu3 %v1917_v9  ;;  %v217_v9 = vld [vmem:[%s2768_s25 + $0x38] sm:$0xff]  ;;  %v2355_v41 = vld [vmem:[#allocation5 + $0x1b4] sm:$0xf]  ;;  %v1930_v50 = vld [vmem:[#allocation5 + $0x24] sm:$0xf0] }
  0x44   : > { %2412 = vmatpush.bf16.msra.mxu1 %v2013_v13  ;;  %v2900_v27 = vpack.c.bf16 %v220_v10, %v217_v9  ;;  %v2304_v49 = vld [vmem:[#allocation5 + $0x1c] sm:$0xf]  ;;  %v2086_v58 = vld [vmem:[#allocation5 + $0x15c] sm:$0xf0]  ;;  %v2301_v59 = vld [vmem:[#allocation5 + $0x4] sm:$0xf] }
  0x45   : > { %2420 = vmatpush.bf16.msra.mxu2 %v2822_v14  ;;  %v1933_v55 = vor.u32 %v2304_v49, %v1930_v50  ;;  %v2352_v56 = vld [vmem:[#allocation5 + $0x19c] sm:$0xf]  ;;  %v2349_v5 = vld [vmem:[#allocation5 + $0x184] sm:$0xf] }
  0x46   : > { %770 = vmatmul.bf16.vlgmr.msra.gmra.mxu0 %v2827_v20  ;;  %780 = vmatmul.bf16.vlgmr.msra.gmra.mxu3 %v2829_v21 }
  0x47   : > { %811 = vmatpush.bf16.msrb.mxu0 %v2778_v7  ;;  %829 = vmatmul.bf16.vlgmr.msra.gmra.mxu1 %v2831_v22  ;;  %v230_v7 = vld [vmem:[%s2768_s25 + $0xa0] sm:$0xff] }
  0x48   : > { %878 = vmatmul.bf16.vlgmr.msra.gmra.mxu2 %v2833_v23  ;;  %v2858_v36 = vpack.c.bf16 %v233_v32, %v230_v7  ;;  %909 = vmatpush.bf16.msrb.mxu3 %v2005_v51  ;;  %v2358_v32 = vld [vmem:[#allocation5 + $0x1cc] sm:$0xf]  ;;  %v246_v51 = vld [vmem:[%s2768_s25 + $0x120] sm:$0xff] }
  0x4b   : > { %812 = vmatpush.bf16.msrb.mxu0 %v2784_v16  ;;  %v2854_v16 = vpack.c.bf16 %v231_v29, %v228_v28  ;;  %v2902_v28 = vpack.c.bf16 %v244_v12, %v241_v11  ;;  %v2340_v11 = vld [vmem:[#allocation5 + $0x13c] sm:$0xf]  ;;  %v2074_v12 = vld [vmem:[#allocation5 + $0x144] sm:$0xf0] }
  0x4c   : > { %910 = vmatpush.bf16.msrb.mxu3 %v1993_v57  ;;  %v2122_v57 = vld [vmem:[#allocation5 + $0x1a4] sm:$0xf0] }
  0x4d   : > { %v2125_v2 = vor.u32 %v2352_v56, %v2122_v57  ;;  %v2325_v56 = vld [vmem:[#allocation5 + $0xc4] sm:$0xf]  ;;  %v2014_v57 = vld [vmem:[#allocation5 + $0xcc] sm:$0xf0] }
  0x4f   : > { %813 = vmatpush.bf16.msrb.mxu0 %v2790_v25  ;;  %v2856_v25 = vpack.c.bf16 %v232_v31, %v229_v30  ;;  %v2310_v30 = vld [vmem:[#allocation5 + $0x4c] sm:$0xf]  ;;  %v1954_v31 = vld [vmem:[#allocation5 + $0x54] sm:$0xf0] }
  0x50   : > { %v1957_v7 = vor.u32 %v2310_v30, %v1954_v31  ;;  %v2334_v30 = vld [vmem:[#allocation5 + $0x10c] sm:$0xf]  ;;  %v2050_v31 = vld [vmem:[#allocation5 + $0x114] sm:$0xf0] }
  0x53   : > { %814 = vmatpush.bf16.msrb.mxu0 %v2796_v34  ;;  %v234_v34 = vld [vmem:[%s2768_s25 + $0xc0] sm:$0xff] }
  0x56   : > { %775 = vmatmul.bf16.gmra.mxu0 %v2852_v33  ;;  %785 = vmatmul.bf16.gmra.mxu3 %v2854_v16 }
  0x57   : > { %815 = vmatpush.bf16.msrb.mxu0 %v2802_v43  ;;  %834 = vmatmul.bf16.gmra.mxu1 %v2856_v25  ;;  %v2874_v43 = vpack.c.bf16 %v237_v37, %v234_v34  ;;  %v2146_v34 = vld [vmem:[#allocation5 + $0x1d4] sm:$0xf0]  ;;  %v2307_v37 = vld [vmem:[#allocation5 + $0x34] sm:$0xf] }
  0x58   : > { %883 = vmatmul.bf16.gmra.mxu2 %v2858_v36  ;;  %v1945_v40 = vor.u32 %v2307_v37, %v1942_v38  ;;  %v2038_v37 = vld [vmem:[#allocation5 + $0xfc] sm:$0xf0]  ;;  %v253_v38 = vld [vmem:[%s2768_s25 + $0x158] sm:$0xff] }
  0x5b   : > { %816 = vmatpush.bf16.msrb.mxu0 %v2808_v52  ;;  %v2370_v52 = vld [vmem:[#allocation5 + $0x22c] sm:$0xf] }
  0x5f   : > { %817 = vmatpush.bf16.msrb.mxu0 %v2025_v61  ;;  %v2316_v61 = vld [vmem:[#allocation5 + $0x7c] sm:$0xf] }
  0x60   : > { %v1981_v1 = vor.u32 %v2316_v61, %v1978_v63  ;;  %v247_v61 = vld [vmem:[%s2768_s25 + $0x128] sm:$0xff]  ;;  %v212_v63 = vld [vmem:[%s2768_s25 + $0x10] sm:$0xff] }
  0x62   : > { %911 = vmatpush.bf16.msrb.mxu3 %v1981_v1  ;;  %v251_v1 = vld [vmem:[%s2768_s25 + $0x148] sm:$0xff] }
  0x63   : > { %818 = vmatpush.bf16.msrb.mxu0 %v2013_v13  ;;  %v242_v13 = vld [vmem:[%s2768_s25 + $0x100] sm:$0xff] }
  0x64   : > { %v2904_v29 = vpack.c.bf16 %v245_v15, %v242_v13 }
  0x66   : > { %790 = vmatmul.bf16.gmra.mxu3 %v2874_v43  ;;  %819 = vmatmul.bf16.vlgmr.msrb.gmra.mxu0 %v2876_v46 }
  0x67   : > { %860 = vmatpush.bf16.msra.mxu0 %v2780_v8  ;;  %839 = vmatmul.bf16.gmra.mxu1 %v2879_v47  ;;  %v2197_v8 = vor.u32 %v2370_v52, %v2194_v54  ;;  %v249_v52 = vld [vmem:[%s2768_s25 + $0x138] sm:$0xff]  ;;  %v2101_v54 = vor.u32 %v2346_v39, %v2098_v45  ;;  %v218_v39 = vld [vmem:[%s2768_s25 + $0x40] sm:$0xff] }
  0x68   : > { %888 = vmatmul.bf16.gmra.mxu2 %v2881_v48  ;;  %912 = vmatpush.bf16.msrb.mxu3 %v1969_v18  ;;  %v2922_v9 = vpack.c.bf16 %v249_v52, %v246_v51  ;;  %v2077_v18 = vor.u32 %v2340_v11, %v2074_v12  ;;  %v257_v45 = vld [vmem:[%s2768_s25 + $0x178] sm:$0xff]  ;;  %v2026_v52 = vld [vmem:[#allocation5 + $0xe4] sm:$0xf0] }
  0x69   : > { %1007 = vmatpush.bf16.msrb.mxu1 %v2197_v8  ;;  %v2343_v8 = vld [vmem:[#allocation5 + $0x154] sm:$0xf]  ;;  %v2328_v51 = vld [vmem:[#allocation5 + $0xdc] sm:$0xf] }
  0x6a   : > { %v2089_v3 = vor.u32 %v2343_v8, %v2086_v58  ;;  %3281 = vst [vmem:[#allocation9_spill] sm:$0xff] %v2922_v9  ;;  %v2017_v58 = vor.u32 %v2325_v56, %v2014_v57 }
  0x6b   : > { %861 = vmatpush.bf16.msra.mxu0 %v2786_v17  ;;  %v2170_v17 = vld [vmem:[#allocation5 + $0x204] sm:$0xf0] }
  0x6c   : > { %v2173_v6 = vor.u32 %v2364_v0, %v2170_v17  ;;  %913 = vmatpush.bf16.msrb.mxu3 %v1957_v7  ;;  %v250_v0 = vld [vmem:[%s2768_s25 + $0x140] sm:$0xff]  ;;  %v248_v17 = vld [vmem:[%s2768_s25 + $0x130] sm:$0xff] }
  0x6d   : > { %1008 = vmatpush.bf16.msrb.mxu1 %v2185_v60  ;;  %v1918_v60 = vld [vmem:[#allocation5 + $0xc] sm:$0xf0]  ;;  %v2926_v13 = vpack.c.bf16 %v250_v0, %v247_v61 }
  0x6e   : > { %v1921_v4 = vor.u32 %v2301_v59, %v1918_v60  ;;  %v252_v7 = vld [vmem:[%s2768_s25 + $0x150] sm:$0xff] }
  0x6f   : > { %862 = vmatpush.bf16.msra.mxu0 %v2792_v26  ;;  %v2158_v26 = vld [vmem:[#allocation5 + $0x1ec] sm:$0xf0]  ;;  %3282 = vst [vmem:[#allocation10_spill] sm:$0xff] %v2926_v13 }
  0x70   : > { %914 = vmatpush.bf16.msrb.mxu3 %v1945_v40  ;;  %v221_v40 = vld [vmem:[%s2768_s25 + $0x58] sm:$0xff] }
  0x71   : > { %1009 = vmatpush.bf16.msrb.mxu1 %v2173_v6  ;;  %v2110_v6 = vld [vmem:[#allocation5 + $0x18c] sm:$0xf0] }
  0x72   : > { %v2113_v15 = vor.u32 %v2349_v5, %v2110_v6 }
  0x73   : > { %863 = vmatpush.bf16.msra.mxu0 %v2798_v35  ;;  %v2161_v35 = vor.u32 %v2361_v19, %v2158_v26  ;;  %v2337_v19 = vld [vmem:[#allocation5 + $0x124] sm:$0xf]  ;;  %v2062_v26 = vld [vmem:[#allocation5 + $0x12c] sm:$0xf0] }
  0x74   : > { %915 = vmatpush.bf16.msrb.mxu3 %v1933_v55  ;;  %v2029_v55 = vor.u32 %v2328_v51, %v2026_v52 }
  0x75   : > { %1010 = vmatpush.bf16.msrb.mxu1 %v2161_v35  ;;  %v2065_v35 = vor.u32 %v2337_v19, %v2062_v26 }
  0x76   : > { %795 = vmatmul.bf16.gmra.mxu3 %v2898_v24  ;;  %824 = vmatmul.bf16.gmra.mxu0 %v2900_v27 }
  0x77   : > { %864 = vmatpush.bf16.msra.mxu0 %v2804_v44  ;;  %844 = vmatmul.bf16.gmra.mxu1 %v2902_v28  ;;  %v2149_v44 = vor.u32 %v2358_v32, %v2146_v34  ;;  %v2053_v32 = vor.u32 %v2334_v30, %v2050_v31  ;;  %v255_v34 = vld [vmem:[%s2768_s25 + $0x168] sm:$0xff] }
  0x78   : > { %893 = vmatmul.bf16.gmra.mxu2 %v2904_v29  ;;  %916 = vmatpush.bf16.msrb.mxu3 %v1921_v4  ;;  %v2942_v50 = vpack.c.bf16 %v255_v34, %v252_v7 }
  0x79   : > { %1011 = vmatpush.bf16.msrb.mxu1 %v2149_v44  ;;  %v2331_v44 = vld [vmem:[#allocation5 + $0xf4] sm:$0xf] }
  0x7a   : > { %v2041_v49 = vor.u32 %v2331_v44, %v2038_v37  ;;  %3284 = vst [vmem:[#allocation12_spill] sm:$0xff] %v2942_v50 }
  0x7b   : > { %865 = vmatpush.bf16.msra.mxu0 %v2810_v53  ;;  %v2137_v53 = vor.u32 %v2355_v41, %v2134_v42  ;;  %v256_v41 = vld [vmem:[%s2768_s25 + $0x170] sm:$0xff]  ;;  %v254_v42 = vld [vmem:[%s2768_s25 + $0x160] sm:$0xff] }
  0x7c   : > { %v2948_v8 = vpack.c.bf16 %v257_v45, %v254_v42 }
  0x7d   : > { %1012 = vmatpush.bf16.msrb.mxu1 %v2137_v53  ;;  %v2944_v53 = vpack.c.bf16 %v221_v40, %v218_v39 }
  0x7e   : > { %3286 = vst [vmem:[#allocation14_spill] sm:$0xff] %v2948_v8 }
  0x7f   : > { %866 = vmatpush.bf16.msra.mxu0 %v2814_v62  ;;  %v215_v62 = vld [vmem:[%s2768_s25 + $0x28] sm:$0xff] }
  0x80   : > { %v2924_v10 = vpack.c.bf16 %v215_v62, %v212_v63 }
  0x81   : > { %1013 = vmatpush.bf16.msrb.mxu1 %v2125_v2 }
  0x83   : > { %867 = vmatpush.bf16.msra.mxu0 %v2822_v14  ;;  %v2928_v14 = vpack.c.bf16 %v251_v1, %v248_v17 }
  0x85   : > { %3283 = vst [vmem:[#allocation11_spill] sm:$0xff] %v2928_v14  ;;  %1014 = vmatpush.bf16.msrb.mxu1 %v2113_v15 }
  0x86   : > { %800 = vmatmul.bf16.gmra.mxu3 %v2922_v9  ;;  %868 = vmatmul.bf16.vlgmr.msra.gmra.mxu0 %v2924_v10 }
  0x87   : > { %958 = vmatpush.bf16.msrb.mxu0 %v2101_v54  ;;  %849 = vmatmul.bf16.gmra.mxu1 %v2926_v13  ;;  %v2946_v54 = vpack.c.bf16 %v256_v41, %v253_v38 }
  0x88   : > { %898 = vmatmul.bf16.gmra.mxu2 %v2928_v14 }
  0x89   : > { %3285 = vst [vmem:[#allocation13_spill] sm:$0xff] %v2946_v54 }
  0x8b   : > { %959 = vmatpush.bf16.msrb.mxu0 %v2089_v3 }
  0x8f   : > { %960 = vmatpush.bf16.msrb.mxu0 %v2077_v18 }
  0x93   : > { %961 = vmatpush.bf16.msrb.mxu0 %v2065_v35 }
  0x96   : > { %805 = vmatmul.bf16.gmra.mxu3 %v2942_v50  ;;  %873 = vmatmul.bf16.gmra.mxu0 %v2944_v53 }
  0x97   : > { %962 = vmatpush.bf16.msrb.mxu0 %v2053_v32  ;;  %854 = vmatmul.bf16.gmra.mxu1 %v2946_v54 }
  0x98   : > { %903 = vmatmul.bf16.gmra.mxu2 %v2948_v8 }
  0x9b   : > { %963 = vmatpush.bf16.msrb.mxu0 %v2041_v49 }
  0x9f   : > { %964 = vmatpush.bf16.msrb.mxu0 %v2029_v55 }
  0xa3   : > { %965 = vmatpush.bf16.msrb.mxu0 %v2017_v58 }
  0xa6   : > { %917 = vmatmul.bf16.vlgmr.msrb.gmra.mxu3 %v2827_v20  ;;  %966 = vmatmul.bf16.vlgmr.msrb.gmra.mxu0 %v2876_v46 }
  0xa7   : > { %1015 = vmatmul.bf16.vlgmr.msrb.gmra.mxu1 %v2924_v10 }
  0xb6   : > { %922 = vmatmul.bf16.gmra.mxu3 %v2852_v33  ;;  %971 = vmatmul.bf16.gmra.mxu0 %v2900_v27 }
  0xb7   : > { %1020 = vmatmul.bf16.gmra.mxu1 %v2944_v53 }
  0xc3   : > { %v771_v59 = vpop.f32.mrf.mxu0 }
  0xc4   : > { %v830_v60 = vpop.f32.mrf.mxu1 }
  0xc6   : > { %927 = vmatmul.bf16.gmra.mxu3 %v2829_v21  ;;  %976 = vmatmul.bf16.gmra.mxu0 %v2831_v22 }
  0xc7   : > { %1025 = vmatmul.bf16.gmra.mxu1 %v2833_v23 }
  0xc9   : > { %v781_v61 = vpop.f32.mrf.mxu3 }
  0xca   : > { %v2963_v63 = vadd.f32 %v830_v60, %v781_v61 }
  0xcb   : > { %v2965_v62 = vpop.f32.mrf.mxu0 }
  0xcc   : > { %v832_v0 = vpop.f32.mrf.mxu1 }
  0xd1   : > { %v783_v17 = vpop.f32.mrf.mxu3 }
  0xd2   : > { %v2967_v1 = vadd.f32 %v832_v0, %v783_v17 }
  0xd3   : > { %v776_v2 = vpop.f32.mrf.mxu0 }
  0xd4   : > { %v835_v3 = vpop.f32.mrf.mxu1 }
  0xd6   : > { %932 = vmatmul.bf16.gmra.mxu3 %v2854_v16  ;;  %981 = vmatmul.bf16.gmra.mxu0 %v2856_v25 }
  0xd7   : > { %1030 = vmatmul.bf16.gmra.mxu1 %v2858_v36 }
  0xd9   : > { %v786_v4 = vpop.f32.mrf.mxu3 }
  0xda   : > { %v2972_v5 = vadd.f32 %v835_v3, %v786_v4 }
  0xdb   : > { %v2974_v6 = vpop.f32.mrf.mxu0 }
  0xdc   : > { %v837_v11 = vpop.f32.mrf.mxu1 }
  0xe1   : > { %v788_v12 = vpop.f32.mrf.mxu3 }
  0xe2   : > { %v2976_v15 = vadd.f32 %v837_v11, %v788_v12 }
  0xe3   : > { %v820_v18 = vpop.f32.mrf.mxu0 }
  0xe4   : > { %v821_v19 = vadd.f32 %v820_v18, %v771_v59  ;;  %v840_v26 = vpop.f32.mrf.mxu1 }
  0xe6   : > { %937 = vmatmul.bf16.gmra.mxu3 %v2874_v43  ;;  %986 = vmatmul.bf16.gmra.mxu0 %v2879_v47 }
  0xe7   : > { %1035 = vmatmul.bf16.gmra.mxu1 %v2881_v48 }
  0xe9   : > { %v791_v35 = vpop.f32.mrf.mxu3 }
  0xea   : > { %v2981_v30 = vadd.f32 %v840_v26, %v791_v35 }
  0xeb   : > { %v822_v31 = vpop.f32.mrf.mxu0 }
  0xec   : > { %v2983_v7 = vpop.f32.mrf.mxu1 }
  0xf1   : > { %v2985_v32 = vpop.f32.mrf.mxu3 }
  0xf3   : > { %v825_v34 = vpop.f32.mrf.mxu0 }
  0xf4   : > { %v826_v44 = vadd.f32 %v825_v34, %v776_v2  ;;  %v845_v37 = vpop.f32.mrf.mxu1 }
  0xf6   : > { %942 = vmatmul.bf16.gmra.mxu3 %v2898_v24  ;;  %991 = vmatmul.bf16.gmra.mxu0 %v2902_v28 }
  0xf7   : > { %1040 = vmatmul.bf16.gmra.mxu1 %v2904_v29 }
  0xf9   : > { %v796_v38 = vpop.f32.mrf.mxu3 }
  0xfa   : > { %v2990_v39 = vadd.f32 %v845_v37, %v796_v38 }
  0xfb   : > { %v827_v40 = vpop.f32.mrf.mxu0 }
  0xfc   : > { %v2992_v41 = vpop.f32.mrf.mxu1 }
 0x101   : > { %v2994_v42 = vpop.f32.mrf.mxu3 }
 0x103   : > { %v869_v45 = vpop.f32.mrf.mxu0 }
 0x104   : > { %v850_v49 = vpop.f32.mrf.mxu1  ;;  %v870_v26 = vadd.f32 %v869_v45, %v821_v19 }
 0x106   : > { %947 = vmatmul.bf16.gmra.mxu3 %v2922_v9  ;;  %996 = vmatmul.bf16.gmra.mxu0 %v2926_v13 }
 0x107   : > { %1045 = vmatmul.bf16.gmra.mxu1 %v2928_v14 }
 0x109   : > { %v801_v51 = vpop.f32.mrf.mxu3 }
 0x10a   : > { %v2999_v52 = vadd.f32 %v850_v49, %v801_v51  ;;  %v879_v49 = vpop.f32.mrf.mxu2  ;;  %v823_v51 = vadd.f32 %v822_v31, %v2965_v62 }
 0x10b   : > { %v871_v55 = vpop.f32.mrf.mxu0 }
 0x10c   : > { %v3001_v56 = vpop.f32.mrf.mxu1 }
 0x111   : > { %v3003_v57 = vpop.f32.mrf.mxu3 }
 0x113   : > { %v874_v58 = vpop.f32.mrf.mxu0 }
 0x114   : > { %v855_v59 = vpop.f32.mrf.mxu1  ;;  %v875_v19 = vadd.f32 %v874_v58, %v826_v44  ;;  %v880_v44 = vadd.f32 %v879_v49, %v2963_v63 }
 0x116   : > { %952 = vmatmul.bf16.gmra.mxu3 %v2942_v50  ;;  %1001 = vmatmul.bf16.gmra.mxu0 %v2946_v54 }
 0x117   : > { %1050 = vmatmul.bf16.gmra.mxu1 %v2948_v8  ;;  %v872_v8 = vadd.f32 %v871_v55, %v823_v51 }
 0x119   : > { %v806_v60 = vpop.f32.mrf.mxu3 }
 0x11a   : > { %v3008_v61 = vadd.f32 %v855_v59, %v806_v60 }
 0x11b   : > { %v876_v0 = vpop.f32.mrf.mxu0 }
 0x11c   : > { %v3010_v17 = vpop.f32.mrf.mxu1 }
 0x121   : > { %v3012_v2 = vpop.f32.mrf.mxu3 }
 0x123   : > { %v967_v3 = vpop.f32.mrf.mxu0 }
 0x124   : > { %v1016_v4 = vpop.f32.mrf.mxu1 }
 0x129   : > { %v918_v11 = vpop.f32.mrf.mxu3 }
 0x12a   : > { %v968_v12 = vadd.f32 %v967_v3, %v918_v11  ;;  %v881_v11 = vpop.f32.mrf.mxu2 }
 0x12b   : > { %v969_v18 = vpop.f32.mrf.mxu0 }
 0x12c   : > { %v1017_v35 = vadd.f32 %v1016_v4, %v968_v12  ;;  %v1018_v34 = vpop.f32.mrf.mxu1 }
 0x12e   : > { %v1203_v37 = vpack.c.bf16 %v1017_v35, %v870_v26  ;;  %v828_v35 = vadd.f32 %v827_v40, %v2974_v6 }
 0x130   : > { %1235 = vst [vmem:[#allocation2] sm:$0xff] %v1203_v37 }
 0x131   : > { %v920_v38 = vpop.f32.mrf.mxu3 }
 0x132   : > { %v970_v59 = vadd.f32 %v969_v18, %v920_v38  ;;  %v877_v18 = vadd.f32 %v876_v0, %v828_v35  ;;  %v884_v37 = vpop.f32.mrf.mxu2  ;;  %v882_v0 = vadd.f32 %v881_v11, %v2967_v1 }
 0x133   : > { %v972_v60 = vpop.f32.mrf.mxu0  ;;  %v885_v63 = vadd.f32 %v884_v37, %v2972_v5 }
 0x134   : > { %v1019_v54 = vadd.f32 %v1018_v34, %v970_v59  ;;  %v1021_v50 = vpop.f32.mrf.mxu1 }
 0x136   : > { %v1205_v14 = vpack.c.bf16 %v1019_v54, %v872_v8 }
 0x138   : > { %1237 = vst [vmem:[#allocation2 + $0xc] sm:$0xff] %v1205_v14 }
 0x139   : > { %v923_v13 = vpop.f32.mrf.mxu3 }
 0x13a   : > { %v973_v9 = vadd.f32 %v972_v60, %v923_v13  ;;  %v886_v38 = vpop.f32.mrf.mxu2 }
 0x13b   : > { %v974_v3 = vpop.f32.mrf.mxu0 }
 0x13c   : > { %v1022_v45 = vadd.f32 %v1021_v50, %v973_v9  ;;  %v1023_v4 = vpop.f32.mrf.mxu1 }
 0x13e   : > { %v1207_v12 = vpack.c.bf16 %v1022_v45, %v875_v19 }
 0x140   : > { %1239 = vst [vmem:[#allocation2 + $0x18] sm:$0xff] %v1207_v12 }
 0x141   : > { %v925_v26 = vpop.f32.mrf.mxu3 }
 0x142   : > { %v975_v62 = vadd.f32 %v974_v3, %v925_v26  ;;  %v889_v45 = vpop.f32.mrf.mxu2 }
 0x143   : > { %v977_v31 = vpop.f32.mrf.mxu0 }
 0x144   : > { %v1024_v55 = vadd.f32 %v1023_v4, %v975_v62  ;;  %v1026_v34 = vpop.f32.mrf.mxu1 }
 0x146   : > { %v1209_v54 = vpack.c.bf16 %v1024_v55, %v877_v18  ;;  %v887_v55 = vadd.f32 %v886_v38, %v2976_v15 }
 0x148   : > { %1241 = vst [vmem:[#allocation2 + $0x24] sm:$0xff] %v1209_v54 }
 0x149   : > { %v928_v14 = vpop.f32.mrf.mxu3 }
 0x14a   : > { %v978_v13 = vadd.f32 %v977_v31, %v928_v14  ;;  %v891_v1 = vpop.f32.mrf.mxu2 }
 0x14b   : > { %v979_v8 = vpop.f32.mrf.mxu0 }
 0x14c   : > { %v1027_v9 = vadd.f32 %v1026_v34, %v978_v13  ;;  %v1028_v50 = vpop.f32.mrf.mxu1 }
 0x14e   : > { %v1211_v58 = vpack.c.bf16 %v1027_v9, %v880_v44  ;;  %v890_v44 = vadd.f32 %v889_v45, %v2981_v30 }
 0x150   : > { %1243 = vst [vmem:[#allocation2 + $0x30] sm:$0xff] %v1211_v58  ;;  %v843_v58 = vadd.f32 %v2983_v7, %v2985_v32  ;;  %v848_v7 = vadd.f32 %v2992_v41, %v2994_v42  ;;  %v853_v41 = vadd.f32 %v3001_v56, %v3003_v57  ;;  %v1996_v57 = vld [vmem:[#allocation5 + $0x98] sm:$0xf] }
 0x151   : > { %v930_v51 = vpop.f32.mrf.mxu3 }
 0x152   : > { %v980_v6 = vadd.f32 %v979_v8, %v930_v51  ;;  %v894_v9 = vpop.f32.mrf.mxu2 }
 0x153   : > { %v982_v40 = vpop.f32.mrf.mxu0  ;;  %v895_v45 = vadd.f32 %v894_v9, %v2990_v39  ;;  %v2104_v9 = vld [vmem:[#allocation5 + $0x170] sm:$0xf] }
 0x154   : > { %v1029_v59 = vadd.f32 %v1028_v50, %v980_v6  ;;  %v1031_v60 = vpop.f32.mrf.mxu1  ;;  %v892_v6 = vadd.f32 %v891_v1, %v843_v58  ;;  %v2348_v58 = vld [vmem:[#allocation5 + $0x178] sm:$0xf0] }
 0x156   : > { %v1213_v3 = vpack.c.bf16 %v1029_v59, %v882_v0 }
 0x158   : > { %1245 = vst [vmem:[#allocation2 + $0x3c] sm:$0xff] %v1213_v3 }
 0x159   : > { %v933_v19 = vpop.f32.mrf.mxu3 }
 0x15a   : > { %v983_v4 = vadd.f32 %v982_v40, %v933_v19 }
 0x15b   : > { %v984_v12 = vpop.f32.mrf.mxu0 }
 0x15c   : > { %v1032_v49 = vadd.f32 %v1031_v60, %v983_v4  ;;  %v1033_v26 = vpop.f32.mrf.mxu1  ;;  %v896_v60 = vpop.f32.mrf.mxu2 }
 0x15e   : > { %v1215_v35 = vpack.c.bf16 %v1032_v49, %v885_v63 }
 0x160   : > { %1247 = vst [vmem:[#allocation2 + $0x48] sm:$0xff] %v1215_v35 }
 0x161   : > { %v935_v62 = vpop.f32.mrf.mxu3 }
 0x162   : > { %v985_v31 = vadd.f32 %v984_v12, %v935_v62  ;;  %v897_v62 = vadd.f32 %v896_v60, %v848_v7  ;;  %v2321_v60 = vld [vmem:[#allocation5 + $0xa0] sm:$0xf0] }
 0x163   : > { %v987_v18 = vpop.f32.mrf.mxu0 }
 0x164   : > { %v1034_v11 = vadd.f32 %v1033_v26, %v985_v31  ;;  %v1036_v34 = vpop.f32.mrf.mxu1  ;;  %v899_v49 = vpop.f32.mrf.mxu2 }
 0x165   : > { %v900_v39 = vadd.f32 %v899_v49, %v2999_v52  ;;  %v2342_v49 = vld [vmem:[#allocation5 + $0x148] sm:$0xf0] }
 0x166   : > { %v1217_v54 = vpack.c.bf16 %v1034_v11, %v887_v55 }
 0x168   : > { %1249 = vst [vmem:[#allocation2 + $0x54] sm:$0xff] %v1217_v54 }
 0x169   : > { %v938_v14 = vpop.f32.mrf.mxu3 }
 0x16a   : > { %v988_v13 = vadd.f32 %v987_v18, %v938_v14 }
 0x16b   : > { %v989_v8 = vpop.f32.mrf.mxu0 }
 0x16c   : > { %v1037_v5 = vadd.f32 %v1036_v34, %v988_v13  ;;  %v1038_v37 = vpop.f32.mrf.mxu1  ;;  %v901_v34 = vpop.f32.mrf.mxu2 }
 0x16e   : > { %v1219_v50 = vpack.c.bf16 %v1037_v5, %v890_v44  ;;  %v2008_v5 = vld [vmem:[#allocation5 + $0xb0] sm:$0xf] }
 0x170   : > { %1251 = vst [vmem:[#allocation2 + $0x60] sm:$0xff] %v1219_v50 }
 0x171   : > { %v940_v51 = vpop.f32.mrf.mxu3 }
 0x172   : > { %v990_v15 = vadd.f32 %v989_v8, %v940_v51  ;;  %v902_v51 = vadd.f32 %v901_v34, %v853_v41 }
 0x173   : > { %v992_v38 = vpop.f32.mrf.mxu0 }
 0x174   : > { %v1039_v40 = vadd.f32 %v1038_v37, %v990_v15  ;;  %v1041_v0 = vpop.f32.mrf.mxu1  ;;  %v2324_v37 = vld [vmem:[#allocation5 + $0xb8] sm:$0xf0]  ;;  %v904_v52 = vpop.f32.mrf.mxu2 }
 0x175   : > { %v2009_v50 = vor.u32 %v2324_v37, %v2008_v5  ;;  %v2369_v5 = vld [vmem:[#allocation5 + $0x220] sm:$0xf0] }
 0x176   : > { %v1221_v59 = vpack.c.bf16 %v1039_v40, %v892_v6 }
 0x177   : > { %1056 = vmatpush.bf16.msrb.mxu2 %v2009_v50 }
 0x178   : > { %1253 = vst [vmem:[#allocation2 + $0x6c] sm:$0xff] %v1221_v59 }
 0x179   : > { %v943_v3 = vpop.f32.mrf.mxu3 }
 0x17a   : > { %v993_v19 = vadd.f32 %v992_v38, %v943_v3  ;;  %v2105_v38 = vor.u32 %v2348_v58, %v2104_v9  ;;  %v2092_v3 = vld [vmem:[#allocation5 + $0x158] sm:$0xf]  ;;  %v2312_v58 = vld [vmem:[#allocation5 + $0x58] sm:$0xf0] }
 0x17b   : > { %v994_v30 = vpop.f32.mrf.mxu0 }
 0x17c   : > { %v1042_v4 = vadd.f32 %v1041_v0, %v993_v19  ;;  %v1043_v12 = vpop.f32.mrf.mxu1  ;;  %1105 = vmatpush.bf16.msra.mxu3 %v2105_v38  ;;  %v1997_v19 = vor.u32 %v2321_v60, %v1996_v57  ;;  %v2336_v38 = vld [vmem:[#allocation5 + $0x118] sm:$0xf0]  ;;  %v2309_v57 = vld [vmem:[#allocation5 + $0x40] sm:$0xf0]  ;;  %v2044_v60 = vld [vmem:[#allocation5 + $0xf8] sm:$0xf] }
 0x17e   : > { %v1223_v63 = vpack.c.bf16 %v1042_v4, %v895_v45  ;;  %v1984_v45 = vld [vmem:[#allocation5 + $0x80] sm:$0xf]  ;;  %v2318_v4 = vld [vmem:[#allocation5 + $0x88] sm:$0xf0]  ;;  %1057 = vmatpush.bf16.msrb.mxu2 %v1997_v19  ;;  %v2333_v19 = vld [vmem:[#allocation5 + $0x100] sm:$0xf0] }
 0x180   : > { %1255 = vst [vmem:[#allocation2 + $0x78] sm:$0xff] %v1223_v63 }
 0x181   : > { %v945_v32 = vpop.f32.mrf.mxu3 }
 0x182   : > { %v995_v26 = vadd.f32 %v994_v30, %v945_v32  ;;  %v2345_v30 = vld [vmem:[#allocation5 + $0x160] sm:$0xf0]  ;;  %v2080_v32 = vld [vmem:[#allocation5 + $0x140] sm:$0xf] }
 0x183   : > { %v997_v35 = vpop.f32.mrf.mxu0  ;;  %v2093_v7 = vor.u32 %v2345_v30, %v2092_v3  ;;  %v2164_v30 = vld [vmem:[#allocation5 + $0x1e8] sm:$0xf] }
 0x184   : > { %v1044_v31 = vadd.f32 %v1043_v12, %v995_v26  ;;  %v1046_v18 = vpop.f32.mrf.mxu1  ;;  %v905_v12 = vadd.f32 %v904_v52, %v3008_v61  ;;  %v2200_v26 = vld [vmem:[#allocation5 + $0x230] sm:$0xf]  ;;  %v2176_v52 = vld [vmem:[#allocation5 + $0x200] sm:$0xf] }
 0x185   : > { %1106 = vmatpush.bf16.msra.mxu3 %v2093_v7  ;;  %v2306_v7 = vld [vmem:[#allocation5 + $0x28] sm:$0xf0] }
 0x186   : > { %v1225_v55 = vpack.c.bf16 %v1044_v31, %v897_v62  ;;  %v2372_v62 = vld [vmem:[#allocation5 + $0x238] sm:$0xf0] }
 0x188   : > { %1257 = vst [vmem:[#allocation2 + $0x84] sm:$0xff] %v1225_v55  ;;  %v2201_v55 = vor.u32 %v2372_v62, %v2200_v26  ;;  %v2330_v26 = vld [vmem:[#allocation5 + $0xe8] sm:$0xf0]  ;;  %v2360_v62 = vld [vmem:[#allocation5 + $0x1d8] sm:$0xf0] }
 0x189   : > { %v948_v1 = vpop.f32.mrf.mxu3 }
 0x18a   : > { %v998_v11 = vadd.f32 %v997_v35, %v948_v1  ;;  %v1985_v35 = vor.u32 %v2318_v4, %v1984_v45  ;;  %v858_v1 = vadd.f32 %v3010_v17, %v3012_v2  ;;  %1154 = vmatpush.bf16.msra.mxu0 %v2201_v55  ;;  %v1960_v2 = vld [vmem:[#allocation5 + $0x50] sm:$0xf]  ;;  %v2363_v45 = vld [vmem:[#allocation5 + $0x1f0] sm:$0xf0]  ;;  %v2045_v4 = vor.u32 %v2333_v19, %v2044_v60  ;;  %v2236_v19 = vld [vmem:[#allocation2 + $0x4] sm:$0xf] }
 0x18b   : > { %v999_v14 = vpop.f32.mrf.mxu0 }
 0x18c   : > { %v1047_v54 = vadd.f32 %v1046_v18, %v998_v11  ;;  %v1048_v8 = vpop.f32.mrf.mxu1  ;;  %v2081_v18 = vor.u32 %v2342_v49, %v2080_v32  ;;  %v906_v11 = vpop.f32.mrf.mxu2  ;;  %1058 = vmatpush.bf16.msrb.mxu2 %v1985_v35  ;;  %v2032_v32 = vld [vmem:[#allocation5 + $0xe0] sm:$0xf]  ;;  %v2152_v35 = vld [vmem:[#allocation5 + $0x1d0] sm:$0xf] }
 0x18d   : > { %v907_v37 = vadd.f32 %v906_v11, %v858_v1  ;;  %v2153_v1 = vor.u32 %v2360_v62, %v2152_v35  ;;  %v3292_v35 = vld [vmem:[#allocation14_spill] sm:$0xff] }
 0x18e   : > { %v1227_v13 = vpack.c.bf16 %v1047_v54, %v900_v39  ;;  %1107 = vmatpush.bf16.msra.mxu3 %v2081_v18  ;;  %v1972_v54 = vld [vmem:[#allocation5 + $0x68] sm:$0xf] }
 0x18f   : > { %v2378_v62 = vld [vmem:[#allocation2 + $0x80] sm:$0xf0] }
 0x190   : > { %1259 = vst [vmem:[#allocation2 + $0x90] sm:$0xff] %v1227_v13  ;;  %v2068_v13 = vld [vmem:[#allocation5 + $0x128] sm:$0xf] }
 0x191   : > { %v950_v42 = vpop.f32.mrf.mxu3 }
 0x192   : > { %v1000_v44 = vadd.f32 %v999_v14, %v950_v42  ;;  %v2315_v14 = vld [vmem:[#allocation5 + $0x70] sm:$0xf0] }
 0x193   : > { %v1002_v40 = vpop.f32.mrf.mxu0  ;;  %v1973_v41 = vor.u32 %v2315_v14, %v1972_v54  ;;  %v2339_v42 = vld [vmem:[#allocation5 + $0x130] sm:$0xf0] }
 0x194   : > { %v1049_v15 = vadd.f32 %v1048_v8, %v1000_v44  ;;  %v1051_v0 = vpop.f32.mrf.mxu1  ;;  %v2188_v44 = vld [vmem:[#allocation5 + $0x218] sm:$0xf]  ;;  %v2069_v50 = vor.u32 %v2339_v42, %v2068_v13  ;;  %v2327_v14 = vld [vmem:[#allocation5 + $0xd0] sm:$0xf0] }
 0x195   : > { %v2189_v17 = vor.u32 %v2369_v5, %v2188_v44  ;;  %1059 = vmatpush.bf16.msrb.mxu2 %v1973_v41  ;;  %v2140_v13 = vld [vmem:[#allocation5 + $0x1b8] sm:$0xf]  ;;  %v2128_v44 = vld [vmem:[#allocation5 + $0x1a0] sm:$0xf]  ;;  %v2354_v5 = vld [vmem:[#allocation5 + $0x1a8] sm:$0xf0] }
 0x196   : > { %v1229_v6 = vpack.c.bf16 %v1049_v15, %v902_v51  ;;  %v2056_v51 = vld [vmem:[#allocation5 + $0x110] sm:$0xf]  ;;  %v1961_v15 = vor.u32 %v2312_v58, %v1960_v2  ;;  %1108 = vmatpush.bf16.msra.mxu3 %v2069_v50  ;;  %v2129_v50 = vor.u32 %v2354_v5, %v2128_v44  ;;  %v2116_v2 = vld [vmem:[#allocation5 + $0x188] sm:$0xf]  ;;  %v2351_v58 = vld [vmem:[#allocation5 + $0x190] sm:$0xf0] }
 0x197   : > { %1155 = vmatpush.bf16.msra.mxu0 %v2189_v17 }
 0x198   : > { %1261 = vst [vmem:[#allocation2 + $0x9c] sm:$0xff] %v1229_v6  ;;  %v2366_v6 = vld [vmem:[#allocation5 + $0x208] sm:$0xf0] }
 0x199   : > { %v953_v59 = vpop.f32.mrf.mxu3  ;;  %1060 = vmatpush.bf16.msrb.mxu2 %v1961_v15  ;;  %v2386_v15 = vld [vmem:[#allocation2 + $0x84] sm:$0xf0] }
 0x19a   : > { %v1003_v56 = vadd.f32 %v1002_v40, %v953_v59  ;;  %v2177_v59 = vor.u32 %v2366_v6, %v2176_v52  ;;  %v2385_v6 = vld [vmem:[#allocation2 + $0x6c] sm:$0xf0] }
 0x19b   : > { %v1004_v39 = vpop.f32.mrf.mxu0 }
 0x19c   : > { %v1052_v63 = vadd.f32 %v1051_v0, %v1003_v56  ;;  %v1053_v8 = vpop.f32.mrf.mxu1  ;;  %v2057_v0 = vor.u32 %v2336_v38, %v2056_v51  ;;  %1156 = vmatpush.bf16.msra.mxu0 %v2177_v59  ;;  %v1948_v56 = vld [vmem:[#allocation5 + $0x38] sm:$0xf]  ;;  %v2117_v51 = vor.u32 %v2351_v58, %v2116_v2  ;;  %v2256_v38 = vld [vmem:[#allocation2 + $0x7c] sm:$0xf] }
 0x19d   : > { %v1949_v3 = vor.u32 %v2309_v57, %v1948_v56  ;;  %v2257_v52 = vor.u32 %v2386_v15, %v2256_v38  ;;  %v2383_v56 = vld [vmem:[#allocation2 + $0x3c] sm:$0xf0]  ;;  %v2244_v57 = vld [vmem:[#allocation2 + $0x34] sm:$0xf] }
 0x19e   : > { %v1231_v31 = vpack.c.bf16 %v1052_v63, %v905_v12  ;;  %1109 = vmatpush.bf16.msra.mxu3 %v2057_v0  ;;  %v2165_v12 = vor.u32 %v2363_v45, %v2164_v30  ;;  %v1936_v63 = vld [vmem:[#allocation5 + $0x20] sm:$0xf]  ;;  %v2245_v60 = vor.u32 %v2383_v56, %v2244_v57 }
 0x19f   : > { %1061 = vmatpush.bf16.msrb.mxu2 %v1949_v3  ;;  %v1937_v49 = vor.u32 %v2306_v7, %v1936_v63  ;;  %v2240_v3 = vld [vmem:[#allocation2 + $0x1c] sm:$0xf]  ;;  %v2204_v45 = vld [vmem:[#allocation2] sm:$0xf]  ;;  %v2216_v63 = vld [vmem:[#allocation2 + $0x48] sm:$0xf] }
 0x1a0   : > { %1263 = vst [vmem:[#allocation2 + $0xa8] sm:$0xff] %v1231_v31  ;;  %1157 = vmatpush.bf16.msra.mxu0 %v2165_v12  ;;  %v2033_v31 = vor.u32 %v2330_v26, %v2032_v32  ;;  %v3289_v32 = vld [vmem:[#allocation11_spill] sm:$0xff]  ;;  %v2379_v44 = vld [vmem:[#allocation2 + $0x98] sm:$0xf0] }
 0x1a1   : > { %v955_v61 = vpop.f32.mrf.mxu3 }
 0x1a2   : > { %v1005_v34 = vadd.f32 %v1004_v39, %v955_v61  ;;  %1110 = vmatpush.bf16.msra.mxu3 %v2045_v4  ;;  %v1924_v39 = vld [vmem:[#allocation5 + $0x8] sm:$0xf]  ;;  %v2303_v61 = vld [vmem:[#allocation5 + $0x10] sm:$0xf0] }
 0x1a3   : > { %1062 = vmatpush.bf16.msrb.mxu2 %v1937_v49  ;;  %v1925_v54 = vor.u32 %v2303_v61, %v1924_v39  ;;  %v2220_v49 = vld [vmem:[#allocation2 + $0x60] sm:$0xf] }
 0x1a4   : > { %v1054_v9 = vadd.f32 %v1053_v8, %v1005_v34  ;;  %v2020_v34 = vld [vmem:[#allocation5 + $0xc8] sm:$0xf]  ;;  %1158 = vmatpush.bf16.msra.mxu0 %v2153_v1  ;;  %v2357_v8 = vld [vmem:[#allocation5 + $0x1c0] sm:$0xf0] }
 0x1a5   : > { %v2021_v41 = vor.u32 %v2327_v14, %v2020_v34  ;;  %v2141_v42 = vor.u32 %v2357_v8, %v2140_v13 }
 0x1a6   : > { %v1233_v40 = vpack.c.bf16 %v1054_v9, %v907_v37  ;;  %1111 = vmatpush.bf16.msra.mxu3 %v2033_v31  ;;  %v2387_v37 = vld [vmem:[#allocation2 + $0x9c] sm:$0xf0]  ;;  %v2260_v9 = vld [vmem:[#allocation2 + $0x94] sm:$0xf] }
 0x1a7   : > { %v2264_v18 = vld [vmem:[#allocation2 + $0xac] sm:$0xf]  ;;  %1063 = vmatpush.bf16.msrb.mxu2 %v1925_v54  ;;  %v2261_v17 = vor.u32 %v2387_v37, %v2260_v9  ;;  %v2228_v9 = vld [vmem:[#allocation2 + $0x90] sm:$0xf]  ;;  %v2232_v56 = vld [vmem:[#allocation2 + $0xa8] sm:$0xf] }
 0x1a8   : > { %1265 = vst [vmem:[#allocation2 + $0xb4] sm:$0xff] %v1233_v40  ;;  %1159 = vmatpush.bf16.msra.mxu0 %v2141_v42  ;;  %v2252_v40 = vld [vmem:[#allocation2 + $0x64] sm:$0xf] }
 0x1a9   : > { %v2253_v0 = vor.u32 %v2385_v6, %v2252_v40 }
 0x1aa   : > { %1112 = vmatpush.bf16.msra.mxu3 %v2021_v41  ;;  %1064 = vmatmul.bf16.vlgmr.msrb.gmra.mxu2 %v2827_v20  ;;  %v2384_v20 = vld [vmem:[#allocation2 + $0x54] sm:$0xf0] }
 0x1ac   : > { %1160 = vmatpush.bf16.msra.mxu0 %v2129_v50  ;;  %v2229_v50 = vor.u32 %v2379_v44, %v2228_v9 }
 0x1ad   : > { %1113 = vmatmul.bf16.vlgmr.msra.gmra.mxu3 %v2876_v46  ;;  %v2248_v46 = vld [vmem:[#allocation2 + $0x4c] sm:$0xf] }
 0x1ae   : > { %v2249_v59 = vor.u32 %v2384_v20, %v2248_v46 }
 0x1af   : > { %v2388_v55 = vld [vmem:[#allocation2 + $0xb4] sm:$0xf0]  ;;  %v2380_v20 = vld [vmem:[#allocation2 + $0xb0] sm:$0xf0] }
 0x1b0   : > { %v2265_v11 = vor.u32 %v2388_v55, %v2264_v18  ;;  %1161 = vmatpush.bf16.msra.mxu0 %v2117_v51  ;;  %v2224_v55 = vld [vmem:[#allocation2 + $0x78] sm:$0xf]  ;;  %v2233_v57 = vor.u32 %v2380_v20, %v2232_v56 }
 0x1b1   : > { %v2225_v1 = vor.u32 %v2378_v62, %v2224_v55 }
 0x1b2   : > { %1417 = vmatpush.bf16.xpose.msra.mxu1 %v2265_v11 }
 0x1b3   : > { %1162 = vmatmul.bf16.vlgmr.msra.gmra.mxu0 %v2924_v10  ;;  %v2382_v10 = vld [vmem:[#allocation2 + $0x24] sm:$0xf0] }
 0x1ba   : > { %1418 = vmatpush.bf16.xpose.msra.mxu1 %v2261_v17  ;;  %1069 = vmatmul.bf16.gmra.mxu2 %v2852_v33  ;;  %v2241_v33 = vor.u32 %v2382_v10, %v2240_v3 }
 0x1bd   : > { %1118 = vmatmul.bf16.gmra.mxu3 %v2900_v27  ;;  %v2381_v27 = vld [vmem:[#allocation2 + $0xc] sm:$0xf0] }
 0x1be   : > { %v2237_v30 = vor.u32 %v2381_v27, %v2236_v19  ;;  %v1466_v27 = vlaneseq }
 0x1c2   : > { %1419 = vmatpush.bf16.xpose.msra.mxu1 %v2257_v52 }
 0x1c3   : > { %1167 = vmatmul.bf16.gmra.mxu0 %v2944_v53  ;;  %v2373_v53 = vld [vmem:[#allocation2 + $0x8] sm:$0xf0] }
 0x1ca   : > { %1420 = vmatpush.bf16.xpose.msra.mxu1 %v2253_v0  ;;  %1074 = vmatmul.bf16.gmra.mxu2 %v2829_v21  ;;  %v2205_v21 = vor.u32 %v2373_v53, %v2204_v45  ;;  %v3056_v45 = vand.u32 127, %v1466_v27 }
 0x1cd   : > { %1123 = vmatmul.bf16.gmra.mxu3 %v2831_v22  ;;  %v2374_v22 = vld [vmem:[#allocation2 + $0x20] sm:$0xf0] }
 0x1d2   : > { %1421 = vmatpush.bf16.xpose.msra.mxu1 %v2249_v59 }
 0x1d3   : > { %1172 = vmatmul.bf16.gmra.mxu0 %v2833_v23  ;;  %v2208_v23 = vld [vmem:[#allocation2 + $0x18] sm:$0xf] }
 0x1d4   : > { %v2209_v4 = vor.u32 %v2374_v22, %v2208_v23 }
 0x1da   : > { %1422 = vmatpush.bf16.xpose.msra.mxu1 %v2245_v60  ;;  %1079 = vmatmul.bf16.gmra.mxu2 %v2854_v16  ;;  %v2375_v16 = vld [vmem:[#allocation2 + $0x38] sm:$0xf0] }
 0x1dd   : > { %1128 = vmatmul.bf16.gmra.mxu3 %v2856_v25  ;;  %v2212_v25 = vld [vmem:[#allocation2 + $0x30] sm:$0xf] }
 0x1de   : > { %v2213_v12 = vor.u32 %v2375_v16, %v2212_v25 }
 0x1e2   : > { %1423 = vmatpush.bf16.xpose.msra.mxu1 %v2241_v33 }
 0x1e3   : > { %1177 = vmatmul.bf16.gmra.mxu0 %v2858_v36  ;;  %v3287_v36 = vld [vmem:[#allocation9_spill] sm:$0xff] }
 0x1ea   : > { %1424 = vmatpush.bf16.xpose.msra.mxu1 %v2237_v30  ;;  %1084 = vmatmul.bf16.gmra.mxu2 %v2874_v43  ;;  %v3288_v43 = vld [vmem:[#allocation10_spill] sm:$0xff] }
 0x1ed   : > { %1133 = vmatmul.bf16.gmra.mxu3 %v2879_v47  ;;  %v2376_v47 = vld [vmem:[#allocation2 + $0x50] sm:$0xf0] }
 0x1ee   : > { %v2217_v7 = vor.u32 %v2376_v47, %v2216_v63 }
 0x1f1   : > { %1425 = vmatmul.bf16.vlgmr.msra.gmra.mxu1 %v2205_v21  ;;  %v3058_v21 = vshrl.u32 %v1466_v27, 7 }
 0x1f3   : > { %1182 = vmatmul.bf16.gmra.mxu0 %v2881_v48  ;;  %v3290_v48 = vld [vmem:[#allocation12_spill] sm:$0xff]  ;;  %vm1502_vm0 = vcmp.le.s32.totalorder %v3056_v45, %v3058_v21  ;;  %v1470_v47 = vadd.s32 8, %v3058_v21 }
 0x1f5   : > { %vm1503_vm1 = vcmp.le.s32.totalorder %v3056_v45, %v1470_v47 }
 0x1fa   : > { %1089 = vmatmul.bf16.gmra.mxu2 %v2898_v24  ;;  %v3291_v24 = vld [vmem:[#allocation13_spill] sm:$0xff] }
 0x1fd   : > { %1138 = vmatmul.bf16.gmra.mxu3 %v2902_v28  ;;  %v2377_v28 = vld [vmem:[#allocation2 + $0x68] sm:$0xf0] }
 0x1fe   : > { %v2221_v26 = vor.u32 %v2377_v28, %v2220_v49 }
 0x201   : > { %1430 = vmatmul.bf16.gmra.mxu1 %v2209_v4 }
 0x203   : > { %1187 = vmatmul.bf16.gmra.mxu0 %v2904_v29 }
 0x20a   : > { %1094 = vmatmul.bf16.gmra.mxu2 %v3287_v36 }
 0x20d   : > { %1143 = vmatmul.bf16.gmra.mxu3 %v3288_v43 }
 0x211   : > { %1435 = vmatmul.bf16.gmra.mxu1 %v2213_v12 }
 0x213   : > { %1192 = vmatmul.bf16.gmra.mxu0 %v3289_v32 }
 0x21a   : > { %1099 = vmatmul.bf16.gmra.mxu2 %v3290_v48 }
 0x21d   : > { %1148 = vmatmul.bf16.gmra.mxu3 %v3291_v24 }
 0x221   : > { %1440 = vmatmul.bf16.gmra.mxu1 %v2217_v7 }
 0x223   : > { %1197 = vmatmul.bf16.gmra.mxu0 %v3292_v35  ;;  %v1471_v35 = vadd.s32 16, %v3058_v21 }
 0x225   : > { %vm1504_vm2 = vcmp.le.s32.totalorder %v3056_v45, %v1471_v35 }
 0x22d   : > { %v1065_v29 = vpop.f32.mrf.mxu2 }
 0x230   : > { %v1114_v31 = vpop.f32.mrf.mxu3  ;;  %v1163_v11 = vpop.f32.mrf.mxu0 }
 0x231   : > { %1445 = vmatmul.bf16.gmra.mxu1 %v2221_v26  ;;  %v1115_v18 = vadd.f32 %v1114_v31, %v1065_v29 }
 0x233   : > { %v1164_v39 = vadd.f32 %v1163_v11, %v1115_v18 }
 0x235   : > { %v1204_v61 = vpack.c.bf16 %v1164_v39, %v1164_v39  ;;  %v1067_v34 = vpop.f32.mrf.mxu2 }
 0x237   : > { %1236 = vst [vmem:[#allocation2 + $0x8] sm:$0xf] %v1204_v61  ;;  %v1472_v61 = vadd.s32 24, %v3058_v21 }
 0x238   : > { %v1116_v54 = vpop.f32.mrf.mxu3  ;;  %v1165_v13 = vpop.f32.mrf.mxu0 }
 0x239   : > { %v1117_v14 = vadd.f32 %v1116_v54, %v1067_v34  ;;  %vm1505_vm3 = vcmp.le.s32.totalorder %v3056_v45, %v1472_v61 }
 0x23b   : > { %v1166_v8 = vadd.f32 %v1165_v13, %v1117_v14 }
 0x23d   : > { %v1206_v41 = vpack.c.bf16 %v1166_v8, %v1166_v8  ;;  %v1070_v42 = vpop.f32.mrf.mxu2 }
 0x23f   : > { %1238 = vst [vmem:[#allocation2 + $0x14] sm:$0xf] %v1206_v41 }
 0x240   : > { %v1119_v5 = vpop.f32.mrf.mxu3  ;;  %v1168_v17 = vpop.f32.mrf.mxu0 }
 0x241   : > { %1450 = vmatmul.bf16.gmra.mxu1 %v2225_v1  ;;  %v1120_v37 = vadd.f32 %v1119_v5, %v1070_v42  ;;  %v1473_v5 = vadd.s32 32, %v3058_v21 }
 0x243   : > { %v1169_v2 = vadd.f32 %v1168_v17, %v1120_v37  ;;  %vm1506_vm4 = vcmp.le.s32.totalorder %v3056_v45, %v1473_v5 }
 0x245   : > { %v1208_v58 = vpack.c.bf16 %v1169_v2, %v1169_v2  ;;  %v1072_v51 = vpop.f32.mrf.mxu2 }
 0x247   : > { %1240 = vst [vmem:[#allocation2 + $0x20] sm:$0xf] %v1208_v58 }
 0x248   : > { %v1121_v15 = vpop.f32.mrf.mxu3  ;;  %v1170_v52 = vpop.f32.mrf.mxu0 }
 0x249   : > { %v1122_v38 = vadd.f32 %v1121_v15, %v1072_v51 }
 0x24b   : > { %v1171_v6 = vadd.f32 %v1170_v52, %v1122_v38  ;;  %v1474_v38 = vadd.s32 40, %v3058_v21 }
 0x24d   : > { %v1210_v40 = vpack.c.bf16 %v1171_v6, %v1171_v6  ;;  %v1075_v0 = vpop.f32.mrf.mxu2  ;;  %vm1507_vm5 = vcmp.le.s32.totalorder %v3056_v45, %v1474_v38 }
 0x24f   : > { %1242 = vst [vmem:[#allocation2 + $0x2c] sm:$0xf] %v1210_v40 }
 0x250   : > { %v1124_v46 = vpop.f32.mrf.mxu3  ;;  %v1173_v60 = vpop.f32.mrf.mxu0 }
 0x251   : > { %1455 = vmatmul.bf16.gmra.mxu1 %v2229_v50  ;;  %v1125_v59 = vadd.f32 %v1124_v46, %v1075_v0 }
 0x253   : > { %v1174_v10 = vadd.f32 %v1173_v60, %v1125_v59 }
 0x255   : > { %v1212_v3 = vpack.c.bf16 %v1174_v10, %v1174_v10  ;;  %v1077_v33 = vpop.f32.mrf.mxu2 }
 0x257   : > { %1244 = vst [vmem:[#allocation2 + $0x38] sm:$0xf] %v1212_v3 }
 0x258   : > { %v1126_v19 = vpop.f32.mrf.mxu3  ;;  %v1175_v53 = vpop.f32.mrf.mxu0 }
 0x259   : > { %v1127_v30 = vadd.f32 %v1126_v19, %v1077_v33 }
 0x25b   : > { %v1176_v22 = vadd.f32 %v1175_v53, %v1127_v30 }
 0x25d   : > { %v1214_v23 = vpack.c.bf16 %v1176_v22, %v1176_v22  ;;  %v1080_v4 = vpop.f32.mrf.mxu2  ;;  %v1476_v22 = vadd.s32 56, %v3058_v21 }
 0x25f   : > { %1246 = vst [vmem:[#allocation2 + $0x44] sm:$0xf] %v1214_v23  ;;  %vm1509_vm7 = vcmp.le.s32.totalorder %v3056_v45, %v1476_v22 }
 0x260   : > { %v1129_v16 = vpop.f32.mrf.mxu3  ;;  %v1178_v43 = vpop.f32.mrf.mxu0 }
 0x261   : > { %1460 = vmatmul.bf16.gmra.mxu1 %v2233_v57  ;;  %v1130_v25 = vadd.f32 %v1129_v16, %v1080_v4  ;;  %v1475_v57 = vadd.s32 48, %v3058_v21 }
 0x263   : > { %v1179_v63 = vadd.f32 %v1178_v43, %v1130_v25  ;;  %vm1508_vm6 = vcmp.le.s32.totalorder %v3056_v45, %v1475_v57  ;;  %v2268_v57 = vld [vmem:[#allocation2 + $0x8] sm:$0xf] }
 0x265   : > { %v1216_v7 = vpack.c.bf16 %v1179_v63, %v1179_v63  ;;  %v1082_v32 = vpop.f32.mrf.mxu2 }
 0x267   : > { %1248 = vst [vmem:[#allocation2 + $0x50] sm:$0xf] %v1216_v7  ;;  %v1477_v7 = vadd.s32 64, %v3058_v21 }
 0x268   : > { %v1131_v48 = vpop.f32.mrf.mxu3  ;;  %v1180_v26 = vpop.f32.mrf.mxu0 }
 0x269   : > { %v1132_v24 = vadd.f32 %v1131_v48, %v1082_v32  ;;  %vm1510_vm8 = vcmp.le.s32.totalorder %v3056_v45, %v1477_v7 }
 0x26b   : > { %v1181_v29 = vadd.f32 %v1180_v26, %v1132_v24 }
 0x26d   : > { %v1218_v62 = vpack.c.bf16 %v1181_v29, %v1181_v29  ;;  %v1085_v31 = vpop.f32.mrf.mxu2 }
 0x26e   : > { %v1426_v12 = vpop.f32.mrf.mxu1 }
 0x26f   : > { %v3062_v36 = vsel %vm1502_vm0, %v1426_v12, -inf  ;;  %1250 = vst [vmem:[#allocation2 + $0x5c] sm:$0xf] %v1218_v62  ;;  %vm1783_vm0 = vcmask 523264  }
 0x270   : > { %1534 = vmax.xlane.f32.xlu0 %v3062_v36  ;;  %v1134_v18 = vpop.f32.mrf.mxu3  ;;  %v1183_v39 = vpop.f32.mrf.mxu0 }
 0x271   : > { %v1135_v55 = vadd.f32 %v1134_v18, %v1085_v31 }
 0x273   : > { %v1184_v34 = vadd.f32 %v1183_v39, %v1135_v55 }
 0x275   : > { %v1220_v54 = vpack.c.bf16 %v1184_v34, %v1184_v34  ;;  %v1087_v14 = vpop.f32.mrf.mxu2 }
 0x276   : > { %v1428_v28 = vpop.f32.mrf.mxu1  ;;  %v2392_v38 = vld [vmem:[#allocation2 + $0x58] sm:$0xf0] }
 0x277   : > { %v3067_v49 = vsel %vm1503_vm1, %v1428_v28, -inf  ;;  %1252 = vst [vmem:[#allocation2 + $0x68] sm:$0xf] %v1220_v54 }
 0x278   : > { %1536 = vmax.xlane.f32.xlu0 %v3067_v49  ;;  %v1136_v13 = vpop.f32.mrf.mxu3  ;;  %v1185_v44 = vpop.f32.mrf.mxu0 }
 0x279   : > { %v1137_v8 = vadd.f32 %v1136_v13, %v1087_v14 }
 0x27b   : > { %v1186_v37 = vadd.f32 %v1185_v44, %v1137_v8 }
 0x27d   : > { %v1222_v9 = vpack.c.bf16 %v1186_v37, %v1186_v37  ;;  %v1090_v50 = vpop.f32.mrf.mxu2 }
 0x27e   : > { %v1431_v1 = vpop.f32.mrf.mxu1 }
 0x27f   : > { %v3072_v11 = vsel %vm1504_vm2, %v1431_v1, -inf  ;;  %1254 = vst [vmem:[#allocation2 + $0x74] sm:$0xf] %v1222_v9 }
 0x280   : > { %1538 = vmax.xlane.f32.xlu1 %v3072_v11  ;;  %v1139_v17 = vpop.f32.mrf.mxu3  ;;  %v1188_v15 = vpop.f32.mrf.mxu0 }
 0x281   : > { %v1140_v2 = vadd.f32 %v1139_v17, %v1090_v50  ;;  %v2284_v17 = vld [vmem:[#allocation2 + $0x68] sm:$0xf] }
 0x283   : > { %v1189_v52 = vadd.f32 %v1188_v15, %v1140_v2 }
 0x285   : > { %v1224_v6 = vpack.c.bf16 %v1189_v52, %v1189_v52  ;;  %v1092_v40 = vpop.f32.mrf.mxu2 }
 0x286   : > { %v1433_v41 = vpop.f32.mrf.mxu1  ;;  %v2393_v2 = vld [vmem:[#allocation2 + $0x70] sm:$0xf0] }
 0x287   : > { %v3077_v42 = vsel %vm1505_vm3, %v1433_v41, -inf  ;;  %1256 = vst [vmem:[#allocation2 + $0x80] sm:$0xf] %v1224_v6  ;;  %v2285_v15 = vor.u32 %v2393_v2, %v2284_v17  ;;  %v2276_v6 = vld [vmem:[#allocation2 + $0x38] sm:$0xf] }
 0x288   : > { %1540 = vmax.xlane.f32.xlu1 %v3077_v42  ;;  %v1141_v0 = vpop.f32.mrf.mxu3  ;;  %v1190_v56 = vpop.f32.mrf.mxu0 }
 0x289   : > { %v1142_v20 = vadd.f32 %v1141_v0, %v1092_v40  ;;  %v2391_v40 = vld [vmem:[#allocation2 + $0x40] sm:$0xf0]  ;;  %v2272_v0 = vld [vmem:[#allocation2 + $0x20] sm:$0xf] }
 0x28b   : > { %v1191_v60 = vadd.f32 %v1190_v56, %v1142_v20  ;;  %v2277_v20 = vor.u32 %v2391_v40, %v2276_v6 }
 0x28d   : > { %v1226_v10 = vpack.c.bf16 %v1191_v60, %v1191_v60  ;;  %v1095_v3 = vpop.f32.mrf.mxu2  ;;  %v2389_v60 = vld [vmem:[#allocation2 + $0x10] sm:$0xf0] }
 0x28e   : > { %v1436_v58 = vpop.f32.mrf.mxu1  ;;  %v2288_v5 = vld [vmem:[#allocation2 + $0x80] sm:$0xf] }
 0x28f   : > { %v3082_v51 = vsel %vm1506_vm4, %v1436_v58, -inf  ;;  %1258 = vst [vmem:[#allocation2 + $0x8c] sm:$0xf] %v1226_v10  ;;  %v2280_v58 = vld [vmem:[#allocation2 + $0x50] sm:$0xf]  ;;  %v2269_v10 = vor.u32 %v2389_v60, %v2268_v57 }
 0x290   : > { %1542 = vmax.xlane.f32.xlu2 %v3082_v51  ;;  %v1144_v33 = vpop.f32.mrf.mxu3  ;;  %v1193_v53 = vpop.f32.mrf.mxu0  ;;  %v2281_v52 = vor.u32 %v2392_v38, %v2280_v58  ;;  %v1484_v38 = vadd.s32 120, %v3058_v21 }
 0x291   : > { %v1145_v27 = vadd.f32 %v1144_v33, %v1095_v3 }
 0x292   : > { %vm1517_vm15 = vcmp.le.s32.totalorder %v3056_v45, %v1484_v38 }
 0x293   : > { %v1194_v23 = vadd.f32 %v1193_v53, %v1145_v27 }
 0x295   : > { %v1228_v4 = vpack.c.bf16 %v1194_v23, %v1194_v23  ;;  %v1097_v16 = vpop.f32.mrf.mxu2 }
 0x296   : > { %v1438_v46 = vpop.f32.mrf.mxu1  ;;  %v2394_v9 = vld [vmem:[#allocation2 + $0x88] sm:$0xf0] }
 0x297   : > { %v3087_v59 = vsel %vm1507_vm5, %v1438_v46, -inf  ;;  %1260 = vst [vmem:[#allocation2 + $0x98] sm:$0xf] %v1228_v4  ;;  %v2289_v50 = vor.u32 %v2394_v9, %v2288_v5  ;;  %v2390_v46 = vld [vmem:[#allocation2 + $0x28] sm:$0xf0]  ;;  %v1483_v9 = vadd.s32 112, %v3058_v21 }
 0x298   : > { %1544 = vmax.xlane.f32.xlu2 %v3087_v59  ;;  %v1146_v25 = vpop.f32.mrf.mxu3  ;;  %v1195_v63 = vpop.f32.mrf.mxu0  ;;  %v2273_v56 = vor.u32 %v2390_v46, %v2272_v0 }
 0x299   : > { %v1147_v12 = vadd.f32 %v1146_v25, %v1097_v16  ;;  %v1478_v16 = vadd.s32 72, %v3058_v21  ;;  %vm1516_vm14 = vcmp.le.s32.totalorder %v3056_v45, %v1483_v9 }
 0x29b   : > { %v1196_v32 = vadd.f32 %v1195_v63, %v1147_v12  ;;  %vm1511_vm9 = vcmp.le.s32.totalorder %v3056_v45, %v1478_v16 }
 0x29d   : > { %v1230_v48 = vpack.c.bf16 %v1196_v32, %v1196_v32  ;;  %v1100_v24 = vpop.f32.mrf.mxu2 }
 0x29e   : > { %v1441_v19 = vpop.f32.mrf.mxu1  ;;  %v2292_v41 = vld [vmem:[#allocation2 + $0x98] sm:$0xf] }
 0x29f   : > { %v3092_v30 = vsel %vm1508_vm6, %v1441_v19, -inf  ;;  %1262 = vst [vmem:[#allocation2 + $0xa4] sm:$0xf] %v1230_v48 }
 0x2a0   : > { %1546 = vmax.xlane.f32.xlu0 %v3092_v30  ;;  %v1149_v28 = vpop.f32.mrf.mxu3  ;;  %v1198_v62 = vpop.f32.mrf.mxu0 }
 0x2a1   : > { %v1150_v26 = vadd.f32 %v1149_v28, %v1100_v24 }
 0x2a3   : > { %v1199_v31 = vadd.f32 %v1198_v62, %v1150_v26 }
 0x2a5   : > { %v1232_v18 = vpack.c.bf16 %v1199_v31, %v1199_v31  ;;  %v1102_v55 = vpop.f32.mrf.mxu2 }
 0x2a6   : > { %v1443_v43 = vpop.f32.mrf.mxu1  ;;  %v2395_v44 = vld [vmem:[#allocation2 + $0xa0] sm:$0xf0] }
 0x2a7   : > { %v3097_v47 = vsel %vm1509_vm7, %v1443_v43, -inf  ;;  %1264 = vst [vmem:[#allocation2 + $0xb0] sm:$0xf] %v1232_v18  ;;  %v2293_v37 = vor.u32 %v2395_v44, %v2292_v41 }
 0x2a8   : > { %1548 = vmax.xlane.f32.xlu1 %v3097_v47  ;;  %v1151_v1 = vpop.f32.mrf.mxu3  ;;  %v1200_v61 = vpop.f32.mrf.mxu0 }
 0x2a9   : > { %v1152_v39 = vadd.f32 %v1151_v1, %v1102_v55 }
 0x2ab   : > { %v1201_v34 = vadd.f32 %v1200_v61, %v1152_v39  ;;  %v1481_v39 = vadd.s32 96, %v3058_v21 }
 0x2ad   : > { %v1234_v54 = vpack.c.bf16 %v1201_v34, %v1201_v34  ;;  %vm1514_vm12 = vcmp.le.s32.totalorder %v3056_v45, %v1481_v39 }
 0x2ae   : > { %v1446_v35 = vpop.f32.mrf.mxu1  ;;  %v2296_v14 = vld [vmem:[#allocation2 + $0xb0] sm:$0xf] }
 0x2af   : > { %v3102_v29 = vsel %vm1510_vm8, %v1446_v35, -inf  ;;  %1266 = vst [vmem:[#allocation2 + $0xbc] sm:$0xf] %v1234_v54  ;;  %v1480_v35 = vadd.s32 88, %v3058_v21 }
 0x2b0   : > { %1550 = vmax.xlane.f32.xlu1 %v3102_v29 }
 0x2b1   : > { %vm1513_vm11 = vcmp.le.s32.totalorder %v3056_v45, %v1480_v35 }
 0x2b6   : > { %v2396_v13 = vld [vmem:[#allocation2 + $0xb8] sm:$0xf0]  ;;  %v1448_v19 = vpop.f32.mrf.mxu1 }
 0x2b7   : > { %v2297_v8 = vor.u32 %v2396_v13, %v2296_v14  ;;  %v3115_v7 = vsel %vm1511_vm9, %v1448_v19, -inf }
 0x2b9   : > { %1734 = vmatpush.bf16.msra.mxu2 %v2297_v8  ;;  %v1482_v8 = vadd.s32 104, %v3058_v21 }
 0x2bb   : > { %vm1515_vm13 = vcmp.le.s32.totalorder %v3056_v45, %v1482_v8 }
 0x2bd   : > { %1735 = vmatpush.bf16.msra.mxu2 %v2293_v37 }
 0x2be   : > { %v1451_v25 = vpop.f32.mrf.mxu1 }
 0x2c1   : > { %1736 = vmatpush.bf16.msra.mxu2 %v2289_v50 }
 0x2c5   : > { %1737 = vmatpush.bf16.msra.mxu2 %v2285_v15 }
 0x2c6   : > { %v1453_v32 = vpop.f32.mrf.mxu1 }
 0x2c7   : > { %v3133_v1 = vsel %vm1513_vm11, %v1453_v32, -inf }
 0x2c9   : > { %1738 = vmatpush.bf16.msra.mxu2 %v2281_v52 }
 0x2cd   : > { %1739 = vmatpush.bf16.msra.mxu2 %v2277_v20 }
 0x2ce   : > { %v1456_v18 = vpop.f32.mrf.mxu1 }
 0x2cf   : > { %v3142_v14 = vsel %vm1514_vm12, %v1456_v18, -inf }
 0x2d1   : > { %1740 = vmatpush.bf16.msra.mxu2 %v2273_v56 }
 0x2d5   : > { %1741 = vmatpush.bf16.msra.mxu2 %v2269_v10 }
 0x2d6   : > { %v1458_v13 = vpop.f32.mrf.mxu1 }
 0x2d7   : > { %v3151_v37 = vsel %vm1515_vm13, %v1458_v13, -inf }
 0x2de   : > { %v1461_v50 = vpop.f32.mrf.mxu1 }
 0x2df   : > { %v3160_v15 = vsel %vm1516_vm14, %v1461_v50, -inf }
 0x2e3   : > { %v1535_v3 = vpop.xlane.xlu0 %1534 }
 0x2e4   : > { %v1566_v33 = vsub.f32 %v3062_v36, %v1535_v3 }
 0x2e6   : > { %v1582_v27 = vmul.f32 1.442695, %v1566_v33  ;;  %v1463_v52 = vpop.f32.mrf.mxu1 }
 0x2e7   : > { %v3169_v20 = vsel %vm1517_vm15, %v1463_v52, -inf }
 0x2e8   : > { %2494 = vpow2.f32 %v1582_v27 }
 0x2eb   : > { %v1537_v53 = vpop.xlane.xlu0 %1536 }
 0x2ec   : > { %v1567_v22 = vsub.f32 %v3067_v49, %v1537_v53  ;;  %v1479_v49 = vadd.s32 80, %v3058_v21 }
 0x2ee   : > { %v3107_v23 = vpop.eup %2494  ;;  %v1584_v4 = vmul.f32 1.442695, %v1567_v22  ;;  %vm1512_vm10 = vcmp.le.s32.totalorder %v3056_v45, %v1479_v49 }
 0x2ef   : > { %1614 = vadd.xlane.f32.xlu2 %v3107_v23  ;;  %v3124_v26 = vsel %vm1512_vm10, %v1451_v25, -inf }
 0x2f0   : > { %2496 = vpow2.f32 %v1584_v4 }
 0x2f3   : > { %v1539_v12 = vpop.xlane.xlu1 %1538 }
 0x2f4   : > { %v1568_v36 = vsub.f32 %v3072_v11, %v1539_v12 }
 0x2f6   : > { %v3113_v43 = vpop.eup %2496  ;;  %v1586_v63 = vmul.f32 1.442695, %v1568_v36 }
 0x2f7   : > { %1616 = vadd.xlane.f32.xlu0 %v3113_v43  ;;  %1552 = vmax.xlane.f32.xlu2 %v3115_v7 }
 0x2f8   : > { %2498 = vpow2.f32 %v1586_v63 }
 0x2fb   : > { %v1541_v48 = vpop.xlane.xlu1 %1540 }
 0x2fc   : > { %v1569_v24 = vsub.f32 %v3077_v42, %v1541_v48 }
 0x2fe   : > { %v3122_v28 = vpop.eup %2498  ;;  %v1588_v11 = vmul.f32 1.442695, %v1569_v24 }
 0x2ff   : > { %1618 = vadd.xlane.f32.xlu0 %v3122_v28  ;;  %1554 = vmax.xlane.f32.xlu2 %v3124_v26 }
 0x300   : > { %2500 = vpow2.f32 %v1588_v11 }
 0x303   : > { %v1543_v62 = vpop.xlane.xlu2 %1542 }
 0x304   : > { %v1570_v31 = vsub.f32 %v3082_v51, %v1543_v62 }
 0x306   : > { %v3131_v55 = vpop.eup %2500  ;;  %v1590_v42 = vmul.f32 1.442695, %v1570_v31 }
 0x307   : > { %1620 = vadd.xlane.f32.xlu1 %v3131_v55  ;;  %1556 = vmax.xlane.f32.xlu0 %v3133_v1 }
 0x308   : > { %2502 = vpow2.f32 %v1590_v42 }
 0x30b   : > { %v1545_v61 = vpop.xlane.xlu2 %1544 }
 0x30c   : > { %v1571_v34 = vsub.f32 %v3087_v59, %v1545_v61 }
 0x30e   : > { %v3140_v54 = vpop.eup %2502  ;;  %v1592_v51 = vmul.f32 1.442695, %v1571_v34 }
 0x30f   : > { %1622 = vadd.xlane.f32.xlu1 %v3140_v54  ;;  %1558 = vmax.xlane.f32.xlu0 %v3142_v14 }
 0x310   : > { %2504 = vpow2.f32 %v1592_v51 }
 0x313   : > { %v1547_v41 = vpop.xlane.xlu0 %1546 }
 0x314   : > { %v1572_v44 = vsub.f32 %v3092_v30, %v1547_v41 }
 0x316   : > { %v3149_v5 = vpop.eup %2504  ;;  %v1594_v59 = vmul.f32 1.442695, %v1572_v44 }
 0x317   : > { %1624 = vadd.xlane.f32.xlu2 %v3149_v5  ;;  %1560 = vmax.xlane.f32.xlu1 %v3151_v37 }
 0x318   : > { %2506 = vpow2.f32 %v1594_v59 }
 0x31b   : > { %v1549_v17 = vpop.xlane.xlu1 %1548 }
 0x31c   : > { %v1573_v2 = vsub.f32 %v3097_v47, %v1549_v17 }
 0x31e   : > { %v3158_v58 = vpop.eup %2506  ;;  %v1596_v30 = vmul.f32 1.442695, %v1573_v2 }
 0x31f   : > { %1626 = vadd.xlane.f32.xlu2 %v3158_v58  ;;  %1562 = vmax.xlane.f32.xlu1 %v3160_v15 }
 0x320   : > { %2508 = vpow2.f32 %v1596_v30 }
 0x323   : > { %v1551_v6 = vpop.xlane.xlu1 %1550 }
 0x324   : > { %v1574_v40 = vsub.f32 %v3102_v29, %v1551_v6 }
 0x326   : > { %v3167_v0 = vpop.eup %2508  ;;  %v1598_v47 = vmul.f32 1.442695, %v1574_v40 }
 0x327   : > { %1628 = vadd.xlane.f32.xlu0 %v3167_v0  ;;  %1564 = vmax.xlane.f32.xlu2 %v3169_v20 }
 0x328   : > { %2510 = vpow2.f32 %v1598_v47 }
 0x32e   : > { %v3173_v46 = vpop.eup %2510 }
 0x32f   : > { %1630 = vadd.xlane.f32.xlu0 %v3173_v46 }
 0x362   : > { %v1615_v21 = vpop.xlane.xlu2 %1614 }
 0x363   : > { %2512 = vrcp.f32 %v1615_v21 }
 0x369   : > { %v2513_v60 = vpop.eup %2512 }
 0x36a   : > { %v1617_v56 = vpop.xlane.xlu0 %1616  ;;  %v1553_v45 = vpop.xlane.xlu2 %1552  ;;  %v1662_v3 = vmul.f32 %v2513_v60, %v3107_v23 }
 0x36b   : > { %2514 = vrcp.f32 %v1617_v56  ;;  %v1575_v29 = vsub.f32 %v3115_v7, %v1553_v45 }
 0x36d   : > { %v1600_v57 = vmul.f32 1.442695, %v1575_v29 }
 0x36f   : > { %2516 = vpow2.f32 %v1600_v57 }
 0x371   : > { %v2515_v10 = vpop.eup %2514 }
 0x372   : > { %v1663_v33 = vmul.f32 %v2515_v10, %v3113_v43  ;;  %v1619_v27 = vpop.xlane.xlu0 %1618  ;;  %v1555_v19 = vpop.xlane.xlu2 %1554 }
 0x373   : > { %v1576_v53 = vsub.f32 %v3124_v26, %v1555_v19 }
 0x374   : > { %v1678_v22 = vpack.c.bf16 %v1663_v33, %v1662_v3 }
 0x375   : > { %v3180_v4 = vpop.eup %2516  ;;  %v1602_v16 = vmul.f32 1.442695, %v1576_v53 }
 0x376   : > { %1742 = vmatmul.bf16.vlgmr.msra.gmra.mxu2 %v1678_v22  ;;  %1632 = vadd.xlane.f32.xlu1 %v3180_v4 }
 0x377   : > { %2518 = vpow2.f32 %v1602_v16 }
 0x378   : > { %2520 = vrcp.f32 %v1619_v27 }
 0x37a   : > { %v1621_v25 = vpop.xlane.xlu1 %1620  ;;  %v1557_v12 = vpop.xlane.xlu0 %1556 }
 0x37b   : > { %2522 = vrcp.f32 %v1621_v25  ;;  %v1577_v23 = vsub.f32 %v3133_v1, %v1557_v12 }
 0x37d   : > { %v3184_v36 = vpop.eup %2518  ;;  %v1604_v43 = vmul.f32 1.442695, %v1577_v23 }
 0x37e   : > { %1634 = vadd.xlane.f32.xlu2 %v3184_v36  ;;  %v2521_v63 = vpop.eup %2520 }
 0x37f   : > { %2524 = vpow2.f32 %v1604_v43  ;;  %v1664_v48 = vmul.f32 %v2521_v63, %v3122_v28 }
 0x381   : > { %v2523_v7 = vpop.eup %2522 }
 0x382   : > { %v1623_v49 = vpop.xlane.xlu1 %1622  ;;  %v1559_v32 = vpop.xlane.xlu0 %1558  ;;  %v1665_v24 = vmul.f32 %v2523_v7, %v3131_v55 }
 0x383   : > { %v1578_v11 = vsub.f32 %v3142_v14, %v1559_v32 }
 0x384   : > { %v1679_v26 = vpack.c.bf16 %v1665_v24, %v1664_v48 }
 0x385   : > { %v3190_v35 = vpop.eup %2524  ;;  %v1606_v62 = vmul.f32 1.442695, %v1578_v11 }
 0x386   : > { %1747 = vmatmul.bf16.gmra.mxu2 %v1679_v26  ;;  %1636 = vadd.xlane.f32.xlu0 %v3190_v35 }
 0x387   : > { %2526 = vpow2.f32 %v1606_v62 }
 0x388   : > { %2528 = vrcp.f32 %v1623_v49 }
 0x38a   : > { %v1625_v31 = vpop.xlane.xlu2 %1624  ;;  %v1561_v18 = vpop.xlane.xlu1 %1560 }
 0x38b   : > { %2530 = vrcp.f32 %v1625_v31  ;;  %v1579_v42 = vsub.f32 %v3151_v37, %v1561_v18 }
 0x38d   : > { %v3194_v1 = vpop.eup %2526  ;;  %v1608_v28 = vmul.f32 1.442695, %v1579_v42 }
 0x38e   : > { %1638 = vadd.xlane.f32.xlu1 %v3194_v1  ;;  %v2529_v55 = vpop.eup %2528 }
 0x38f   : > { %2532 = vpow2.f32 %v1608_v28  ;;  %v1666_v51 = vmul.f32 %v2529_v55, %v3140_v54 }
 0x391   : > { %v2531_v39 = vpop.eup %2530 }
 0x392   : > { %v1627_v61 = vpop.xlane.xlu2 %1626  ;;  %v1563_v34 = vpop.xlane.xlu1 %1562  ;;  %v1667_v14 = vmul.f32 %v2531_v39, %v3149_v5 }
 0x393   : > { %v1580_v13 = vsub.f32 %v3160_v15, %v1563_v34 }
 0x394   : > { %v1680_v8 = vpack.c.bf16 %v1667_v14, %v1666_v51 }
 0x395   : > { %v2533_v41 = vpop.eup %2532  ;;  %v1610_v44 = vmul.f32 1.442695, %v1580_v13 }
 0x396   : > { %1752 = vmatmul.bf16.gmra.mxu2 %v1680_v8  ;;  %1640 = vadd.xlane.f32.xlu2 %v2533_v41 }
 0x397   : > { %2534 = vpow2.f32 %v1610_v44 }
 0x398   : > { %2536 = vrcp.f32 %v1627_v61 }
 0x39a   : > { %v1629_v59 = vpop.xlane.xlu0 %1628  ;;  %v1565_v37 = vpop.xlane.xlu2 %1564 }
 0x39b   : > { %2538 = vrcp.f32 %v1629_v59  ;;  %v1581_v9 = vsub.f32 %v3169_v20, %v1565_v37 }
 0x39d   : > { %v3201_v50 = vpop.eup %2534  ;;  %v1612_v54 = vmul.f32 1.442695, %v1581_v9 }
 0x39e   : > { %1642 = vadd.xlane.f32.xlu0 %v3201_v50  ;;  %v2537_v5 = vpop.eup %2536 }
 0x39f   : > { %2540 = vpow2.f32 %v1612_v54  ;;  %v1668_v2 = vmul.f32 %v2537_v5, %v3158_v58 }
 0x3a1   : > { %v2539_v17 = vpop.eup %2538 }
 0x3a2   : > { %v1669_v30 = vmul.f32 %v2539_v17, %v3167_v0  ;;  %v1631_v52 = vpop.xlane.xlu0 %1630 }
 0x3a3   : > { %2542 = vrcp.f32 %v1631_v52 }
 0x3a4   : > { %v1681_v15 = vpack.c.bf16 %v1669_v30, %v1668_v2 }
 0x3a5   : > { %v2541_v38 = vpop.eup %2540 }
 0x3a6   : > { %1757 = vmatmul.bf16.gmra.mxu2 %v1681_v15  ;;  %1644 = vadd.xlane.f32.xlu1 %v2541_v38 }
 0x3a9   : > { %v2543_v40 = vpop.eup %2542 }
 0x3aa   : > { %v1670_v20 = vmul.f32 %v2543_v40, %v3173_v46 }
 0x3e9   : > { %v1633_v6 = vpop.xlane.xlu1 %1632 }
 0x3ea   : > { %2544 = vrcp.f32 %v1633_v6 }
 0x3f0   : > { %v2545_v47 = vpop.eup %2544 }
 0x3f1   : > { %v1671_v21 = vmul.f32 %v2545_v47, %v3180_v4  ;;  %v1635_v58 = vpop.xlane.xlu2 %1634 }
 0x3f2   : > { %2546 = vrcp.f32 %v1635_v58 }
 0x3f3   : > { %v1682_v56 = vpack.c.bf16 %v1671_v21, %v1670_v20 }
 0x3f5   : > { %1762 = vmatmul.bf16.gmra.mxu2 %v1682_v56 }
 0x3f8   : > { %v2547_v46 = vpop.eup %2546 }
 0x3f9   : > { %v1743_v0 = vpop.f32.mrf.mxu2  ;;  %v1637_v45 = vpop.xlane.xlu0 %1636  ;;  %v1672_v60 = vmul.f32 %v2547_v46, %v3184_v36 }
 0x3fa   : > { %1784 = vst.msk [vmem:[%s3213_s27] sm:$0xff] %vm1783_vm0, %v1743_v0  ;;  %2548 = vrcp.f32 %v1637_v45 }
 0x400   : > { %v2549_v29 = vpop.eup %2548 }
 0x401   : > { %v1745_v57 = vpop.f32.mrf.mxu2  ;;  %v1673_v10 = vmul.f32 %v2549_v29, %v3190_v35  ;;  %v1639_v33 = vpop.xlane.xlu1 %1638 }
 0x402   : > { %1785 = vst.msk [vmem:[%s3213_s27 + $0x8] sm:$0xff] %vm1783_vm0, %v1745_v57  ;;  %2550 = vrcp.f32 %v1639_v33 }
 0x403   : > { %v1683_v3 = vpack.c.bf16 %v1673_v10, %v1672_v60 }
 0x405   : > { %1767 = vmatmul.bf16.gmra.mxu2 %v1683_v3 }
 0x408   : > { %v2551_v53 = vpop.eup %2550 }
 0x409   : > { %v1748_v27 = vpop.f32.mrf.mxu2  ;;  %v1641_v19 = vpop.xlane.xlu2 %1640  ;;  %v1674_v16 = vmul.f32 %v2551_v53, %v3194_v1 }
 0x40a   : > { %1786 = vst.msk [vmem:[%s3213_s27 + $0x10] sm:$0xff] %vm1783_vm0, %v1748_v27  ;;  %2552 = vrcp.f32 %v1641_v19 }
 0x410   : > { %v2553_v22 = vpop.eup %2552 }
 0x411   : > { %v1750_v4 = vpop.f32.mrf.mxu2  ;;  %v1675_v25 = vmul.f32 %v2553_v22, %v2533_v41  ;;  %v1643_v23 = vpop.xlane.xlu0 %1642 }
 0x412   : > { %1787 = vst.msk [vmem:[%s3213_s27 + $0x18] sm:$0xff] %vm1783_vm0, %v1750_v4  ;;  %2554 = vrcp.f32 %v1643_v23 }
 0x413   : > { %v1684_v12 = vpack.c.bf16 %v1675_v25, %v1674_v16 }
 0x415   : > { %1772 = vmatmul.bf16.gmra.mxu2 %v1684_v12 }
 0x418   : > { %v2555_v63 = vpop.eup %2554 }
 0x419   : > { %v1753_v36 = vpop.f32.mrf.mxu2  ;;  %v1645_v43 = vpop.xlane.xlu1 %1644  ;;  %v1676_v32 = vmul.f32 %v2555_v63, %v3201_v50 }
 0x41a   : > { %1788 = vst.msk [vmem:[%s3213_s27 + $0x20] sm:$0xff] %vm1783_vm0, %v1753_v36  ;;  %2556 = vrcp.f32 %v1645_v43 }
 0x420   : > { %v2557_v7 = vpop.eup %2556 }
 0x421   : > { %v1755_v49 = vpop.f32.mrf.mxu2  ;;  %v1677_v48 = vmul.f32 %v2557_v7, %v2541_v38 }
 0x422   : > { %1789 = vst.msk [vmem:[%s3213_s27 + $0x28] sm:$0xff] %vm1783_vm0, %v1755_v49 }
 0x423   : > { %v1685_v24 = vpack.c.bf16 %v1677_v48, %v1676_v32 }
 0x425   : > { %1777 = vmatmul.bf16.gmra.mxu2 %v1685_v24 }
 0x429   : > { %v1758_v11 = vpop.f32.mrf.mxu2 }
 0x42a   : > { %1790 = vst.msk [vmem:[%s3213_s27 + $0x30] sm:$0xff] %vm1783_vm0, %v1758_v11 }
 0x431   : > { %v1760_v26 = vpop.f32.mrf.mxu2 }
 0x432   : > { %1791 = vst.msk [vmem:[%s3213_s27 + $0x38] sm:$0xff] %vm1783_vm0, %v1760_v26 }
 0x478   : > { %v1763_v35 = vpop.f32.mrf.mxu2 }
 0x479   : > { %1792 = vst.msk [vmem:[%s3213_s27 + $0x40] sm:$0xff] %vm1783_vm0, %v1763_v35 }
 0x480   : > { %v1765_v62 = vpop.f32.mrf.mxu2 }
 0x481   : > { %1793 = vst.msk [vmem:[%s3213_s27 + $0x48] sm:$0xff] %vm1783_vm0, %v1765_v62 }
 0x488   : > { %v1768_v31 = vpop.f32.mrf.mxu2 }
 0x489   : > { %1794 = vst.msk [vmem:[%s3213_s27 + $0x50] sm:$0xff] %vm1783_vm0, %v1768_v31 }
 0x490   : > { %v1770_v18 = vpop.f32.mrf.mxu2 }
 0x491   : > { %1795 = vst.msk [vmem:[%s3213_s27 + $0x58] sm:$0xff] %vm1783_vm0, %v1770_v18 }
 0x498   : > { %v1773_v42 = vpop.f32.mrf.mxu2 }
 0x499   : > { %1796 = vst.msk [vmem:[%s3213_s27 + $0x60] sm:$0xff] %vm1783_vm0, %v1773_v42 }
 0x4a0   : > { %v1775_v1 = vpop.f32.mrf.mxu2 }
 0x4a1   : > { %1797 = vst.msk [vmem:[%s3213_s27 + $0x68] sm:$0xff] %vm1783_vm0, %v1775_v1 }
 0x4a8   : > { %v1778_v28 = vpop.f32.mrf.mxu2 }
 0x4a9   : > { %1798 = vst.msk [vmem:[%s3213_s27 + $0x70] sm:$0xff] %vm1783_vm0, %v1778_v28 }
 0x4b0   : > { %v1780_v55 = vpop.f32.mrf.mxu2 }
 0x4b1   : > { %1799 = vst.msk [vmem:[%s3213_s27 + $0x78] sm:$0xff] %vm1783_vm0, %v1780_v55 }
 0x4b2 PF: > { %s16_s14 = sadd.s32 1, %s2672_s14   ;;  %s3293_s9 = smov %s2656_s10 }
 0x4b3   : > { %p13_p2 = scmp.ge.s32.totalorder %s16_s14, 4   ;;  %s3294_s10 = smov %s2660_s11 }
 0x4b4   : > { %s3295_s11 = smov %s2759_s3  ;;  %s3296_s12 = smov %s2668_s13 }
 0x4b5   : > { %s3297_s13 = smov %s3299_s26  ;;  %15 = sbr.rel (!%p13_p2) target bundleno = 5 (0x5), region = 77 }
 0x4ba   :  { %1830 = vsyncpa [#allocation4], 1 }
 0x4bb   :  { %1832 = vsyncpa [#allocation4 + $0x1], 1 }
 0x4bc   :  { %1833 = vsyncpa [#allocation6], 1 }

</bundles_post_ra>
